<compile_context>
chip_gen: v7x
topology: tpu7x:2x2x1
jax: 0.10.0
libtpu: 0.0.40
codegen_flags: <defaults>
</compile_context>

<pallas_src>
import functools

import jax
import jax.numpy as jnp
import numpy as np
from jax.experimental import pallas as pl
from jax.experimental.pallas import tpu as pltpu


# ----------------------------------------------------------------------------
# VMEM budget (per-generation) and tile selection
# ----------------------------------------------------------------------------
def _vmem_limit_bytes() -> int:
    try:
        cap = int(pltpu.get_tpu_info().vmem_capacity_bytes)
    except Exception:
        cap = 64 * 1024 * 1024          # conservative (v7x physical VMEM)
    return min((cap * 3) // 4, 96 * 1024 * 1024)


VMEM_LIMIT = _vmem_limit_bytes()
TILE_BUDGET = max(VMEM_LIMIT - 8 * 1024 * 1024, 16 * 1024 * 1024)


def _round_up(x: int, m: int) -> int:
    return ((x + m - 1) // m) * m


def _pad2d(x, rows, cols):
    r, c = x.shape
    return jnp.pad(x, ((0, rows - r), (0, cols - c)))


def _tile_divisors(n):
    """Multiples of 128 that divide n (n is a multiple of 128), descending."""
    return [t for t in range(n, 0, -128) if n % t == 0]


def _pick_tm(m):
    """Largest row tile <= 1024 that still leaves >= 2 row tiles (so the
    'parallel' axis actually splits across v7x's two TensorCores)."""
    divs = [t for t in _tile_divisors(m) if t <= 1024]
    for t in divs:
        if m // t >= 2:
            return t
    return divs[0]          # m == 128: single tile is unavoidable


def _pick_tk(k, tm, dp, budget, row_bytes):
    """Pick (tk, x_resident).  x_resident keeps the whole (K, dp) bf16
    activation in VMEM (DMA'd once) instead of re-streaming it per row tile."""
    x_res_bytes = 2 * k * dp * 2                 # conservative: double-buffered
    x_resident = x_res_bytes <= budget // 3
    avail = budget - row_bytes - (x_res_bytes if x_resident else 0)
    for t in _tile_divisors(k):
        a_bytes = 2 * tm * t * 2                 # A double-buffer, bf16
        xs_bytes = 0 if x_resident else 2 * t * dp * 2
        if a_bytes + xs_bytes <= avail:
            return t, x_resident
    return 128, x_resident


# ----------------------------------------------------------------------------
# Kernel 1: tiled matmul  out = A @ X
#   A streamed in bf16 (tm, tk) tiles, X resident (or streamed), f32 acc
#   directly in the VMEM-resident output block.
# ----------------------------------------------------------------------------
def tiled_matmul(a_bf16, x_bf16):
    M, K = a_bf16.shape
    Kx, dp = x_bf16.shape
    assert K == Kx and dp % 128 == 0
    tm = _pick_tm(M)
    tk, x_resident = _pick_tk(K, tm, dp, TILE_BUDGET, row_bytes=2 * tm * dp * 4)
    grid = (M // tm, K // tk)
    multi_k = grid[1] > 1

    x_spec = (pl.BlockSpec((K, dp), lambda i, k: (0, 0)) if x_resident
              else pl.BlockSpec((tk, dp), lambda i, k: (k, 0)))

    def kernel(a_ref, x_ref, o_ref):
        k = pl.program_id(1)

        @pl.when(k == 0)
        def _():
            o_ref[...] = jnp.zeros_like(o_ref)

        if x_resident and multi_k:
            start = pl.multiple_of(k * tk, tk)
            xs = x_ref[pl.ds(start, tk), :]
        else:
            xs = x_ref[...]
        o_ref[...] += jnp.dot(a_ref[...], xs, preferred_element_type=jnp.float32)

    return pl.pallas_call(
        kernel,
        out_shape=jax.ShapeDtypeStruct((M, dp), jnp.float32),
        grid_spec=pltpu.PrefetchScalarGridSpec(
            num_scalar_prefetch=0,
            grid=grid,
            in_specs=[pl.BlockSpec((tm, tk), lambda i, k: (i, k)), x_spec],
            out_specs=pl.BlockSpec((tm, dp), lambda i, k: (i, 0)),
        ),
        compiler_params=pltpu.CompilerParams(
            dimension_semantics=("parallel", "arbitrary"),
            vmem_limit_bytes=VMEM_LIMIT),
    )(a_bf16, x_bf16)


# ----------------------------------------------------------------------------
# Kernel 2: one hypergraph-propagation layer with fused running-sum
#   h = A @ X ;  next = bf16(h) ;  acc_out = h + acc_in
#   (h is accumulated directly in the acc_out output block; the running-sum
#    add happens only in the last-k epilogue, so no scratch and no extra copy)
# ----------------------------------------------------------------------------
def prop_step(a_bf16, x_bf16, acc_f32):
    M, K = a_bf16.shape
    dp = x_bf16.shape[1]
    tm = _pick_tm(M)
    tk, x_resident = _pick_tk(K, tm, dp, TILE_BUDGET, row_bytes=20 * tm * dp)
    grid = (M // tm, K // tk)
    multi_k = grid[1] > 1

    x_spec = (pl.BlockSpec((K, dp), lambda i, k: (0, 0)) if x_resident
              else pl.BlockSpec((tk, dp), lambda i, k: (k, 0)))

    def kernel(a_ref, x_ref, accin_ref, next_ref, accout_ref):
        k = pl.program_id(1)

        @pl.when(k == 0)
        def _():
            accout_ref[...] = jnp.zeros_like(accout_ref)

        if x_resident and multi_k:
            start = pl.multiple_of(k * tk, tk)
            xs = x_ref[pl.ds(start, tk), :]
        else:
            xs = x_ref[...]
        accout_ref[...] += jnp.dot(a_ref[...], xs,
                                   preferred_element_type=jnp.float32)

        @pl.when(k == pl.num_programs(1) - 1)
        def _():
            h = accout_ref[...]
            next_ref[...] = h.astype(next_ref.dtype)     # bf16 input of next layer
            accout_ref[...] = h + accin_ref[...]         # f32 running sum

    return pl.pallas_call(
        kernel,
        out_shape=(jax.ShapeDtypeStruct((M, dp), jnp.bfloat16),
                   jax.ShapeDtypeStruct((M, dp), jnp.float32)),
        grid_spec=pltpu.PrefetchScalarGridSpec(
            num_scalar_prefetch=0,
            grid=grid,
            in_specs=[pl.BlockSpec((tm, tk), lambda i, k: (i, k)),
                      x_spec,
                      pl.BlockSpec((tm, dp), lambda i, k: (i, 0))],
            out_specs=(pl.BlockSpec((tm, dp), lambda i, k: (i, 0)),
                       pl.BlockSpec((tm, dp), lambda i, k: (i, 0))),
        ),
        compiler_params=pltpu.CompilerParams(
            dimension_semantics=("parallel", "arbitrary"),
            vmem_limit_bytes=VMEM_LIMIT),
    )(a_bf16, x_bf16, acc_f32)


# ----------------------------------------------------------------------------
# Kernel 3: gates + fusion over group rows (VPU row reductions, no N=1 MXU mm)
#   out = sig(x_h.wh+bh)*x_h + sig(x_l.wl+bl)*x_l + sig(x_o.wo+bo)*x_o
# ----------------------------------------------------------------------------
def _fuse_kernel(hg_ref, gi_ref, gg_ref, w_ref, b_ref, out_ref):
    x_h = hg_ref[...]
    x_l = gi_ref[...]
    x_o = gg_ref[...]
    w = w_ref[...]                                # (8, dp); rows 0..2 used

    def coef(x, row):
        logit = jnp.sum(x * w[row:row + 1, :], axis=-1, keepdims=True) + b_ref[row]
        return jax.nn.sigmoid(logit)

    out_ref[...] = (coef(x_h, 0) * x_h
                    + coef(x_l, 1) * x_l
                    + coef(x_o, 2) * x_o)


def gated_fusion(hg_groups, gi_groups, gg_groups, w_cat, b_cat):
    Gp, dp = hg_groups.shape
    tg = _pick_tm(Gp)
    grid = (Gp // tg,)
    row_spec = pl.BlockSpec((tg, dp), lambda i: (i, 0))
    return pl.pallas_call(
        _fuse_kernel,
        out_shape=jax.ShapeDtypeStruct((Gp, dp), jnp.float32),
        grid_spec=pltpu.PrefetchScalarGridSpec(
            num_scalar_prefetch=0,
            grid=grid,
            in_specs=[
                row_spec, row_spec, row_spec,
                pl.BlockSpec((8, dp), lambda i: (0, 0)),               # gate W
                pl.BlockSpec(memory_space=pltpu.MemorySpace.SMEM),     # biases
            ],
            out_specs=row_spec,
        ),
        compiler_params=pltpu.CompilerParams(
            dimension_semantics=("parallel",),
            vmem_limit_bytes=VMEM_LIMIT),
    )(hg_groups, gi_groups, gg_groups, w_cat, b_cat)


# ----------------------------------------------------------------------------
# One-time graph preparation (hoisted out of the per-forward hot path)
# ----------------------------------------------------------------------------
def prepare_graphs(user_hg, gi_graph, gg_graph, *, num_users, num_groups):
    """Pad + bf16-cast the static adjacency matrices once.  The LightGCN
    adjacency is trimmed to its group rows (only those are consumed)."""
    G = num_groups
    n_hg = user_hg.shape[0]
    n_gi = gi_graph.shape[0]
    N1p = _round_up(n_hg, 128)
    N2p = _round_up(n_gi, 128)
    Gp = _round_up(G, 128)
    A1 = _pad2d(user_hg.astype(jnp.bfloat16), N1p, N1p)
    A2 = _pad2d(gi_graph[:G, :].astype(jnp.bfloat16), Gp, N2p)  # group rows only
    A3 = _pad2d(gg_graph.astype(jnp.bfloat16), Gp, Gp)
    return A1, A2, A3


# ----------------------------------------------------------------------------
# compute(): the ConsRec hot path, built from the Pallas kernels above
# ----------------------------------------------------------------------------
def consrec_compute(A1, A2, A3, params, *, num_users, num_groups, layers):
    U, G = num_users, num_groups
    D = params["user_embedding"].shape[1]
    dp = _round_up(max(D, 128), 128)
    N1p = A1.shape[0]
    N2p = A2.shape[1]
    Gp = A3.shape[0]

    hg0 = jnp.concatenate(
        [params["user_embedding"], params["group_embedding"]], axis=0)
    gi0 = jnp.concatenate(
        [params["group_embedding"], params["item_embedding"]], axis=0)
    hg0p = _pad2d(hg0, N1p, dp)                                       # f32
    gi0p = _pad2d(gi0, N2p, dp).astype(jnp.bfloat16)
    ge_p = _pad2d(params["group_embedding"], Gp, dp).astype(jnp.bfloat16)

    # ---- hypergraph propagation, mean over (layers+1) states ----
    acc = hg0p
    x = hg0p.astype(jnp.bfloat16)
    for _ in range(layers):                      # static, small loop
        x, acc = prop_step(A1, x, acc)
    hg_mean = acc * (1.0 / float(layers + 1))

    # ---- one LightGCN layer over [groups; items] (group rows only) ----
    gi_groups = tiled_matmul(A2, gi0p)                                # (Gp, dp)

    # ---- group-group overlap propagation ----
    gg_out = tiled_matmul(A3, ge_p)                                   # (Gp, dp)

    # ---- gates + fusion (group rows only) ----
    hg_groups = _pad2d(hg_mean[U:U + G, :], Gp, dp)

    w_cat = jnp.concatenate(
        [params["hyper_gate_w"].T,
         params["lightgcn_gate_w"].T,
         params["overlap_gate_w"].T], axis=0)                         # (3, D)
    w_cat = _pad2d(w_cat, 8, dp)
    b_cat = jnp.concatenate(
        [params["hyper_gate_b"].reshape(-1),
         params["lightgcn_gate_b"].reshape(-1),
         params["overlap_gate_b"].reshape(-1)], axis=0)               # (3,)

    group_final = gated_fusion(hg_groups, gi_groups, gg_out, w_cat, b_cat)

    user_emb_final = hg_mean[:U, :D]
    group_emb_final = group_final[:G, :D]
    return user_emb_final, group_emb_final


# ----------------------------------------------------------------------------
# forward(): embedding gathers (glue, not the hot path)
# ----------------------------------------------------------------------------
@functools.partial(jax.jit, static_argnames=("num_users", "num_groups", "layers"))
def consrec_forward(params, prepped_graphs, user_inputs, pos_groups, neg_groups,
                    *, num_users, num_groups, layers):
    A1, A2, A3 = prepped_graphs
    all_users, all_groups = consrec_compute(
        A1, A2, A3, params,
        num_users=num_users, num_groups=num_groups, layers=layers)

    user_embeds = all_users[user_inputs]
    pos_embeds = all_groups[pos_groups]
    neg_embeds = all_groups[neg_groups]
    user_emb_ego = params["user_embedding"][user_inputs]
    pos_emb_ego = params["group_embedding"][pos_groups]
    neg_emb_ego = params["group_embedding"][neg_groups]
    return (user_embeds, pos_embeds, neg_embeds,
            user_emb_ego, pos_emb_ego, neg_emb_ego)


# ----------------------------------------------------------------------------
# Plain-JAX glue: parameter init, synthetic graphs, pure-JAX reference
# ----------------------------------------------------------------------------
def xavier_uniform(key, shape):
    fan_in, fan_out = shape[0], shape[1]
    bound = float(np.sqrt(6.0 / (fan_in + fan_out)))
    return jax.random.uniform(key, shape, jnp.float32, -bound, bound)


def make_params(key, num_users, num_items, num_groups, emb_dim):
    ks = jax.random.split(key, 6)
    return {
        "user_embedding": xavier_uniform(ks[0], (num_users, emb_dim)),
        "item_embedding": xavier_uniform(ks[1], (num_items, emb_dim)),
        "group_embedding": xavier_uniform(ks[2], (num_groups, emb_dim)),
        "hyper_gate_w": xavier_uniform(ks[3], (emb_dim, 1)),
        "hyper_gate_b": jnp.zeros((1, 1), jnp.float32),
        "lightgcn_gate_w": xavier_uniform(ks[4], (emb_dim, 1)),
        "lightgcn_gate_b": jnp.zeros((1, 1), jnp.float32),
        "overlap_gate_w": xavier_uniform(ks[5], (emb_dim, 1)),
        "overlap_gate_b": jnp.zeros((1, 1), jnp.float32),
    }


def make_graphs(key, num_users, num_items, num_groups):
    # TODO(synk): torch.sparse.mm has no Pallas sparse equivalent; graphs are
    # densified synthetic row-normalized adjacency matrices.
    n_hg = num_users + num_groups
    n_gi = num_groups + num_items
    k1, k2, k3 = jax.random.split(key, 3)

    def norm_adj(k, n):
        a = (jax.random.uniform(k, (n, n)) > 0.7).astype(jnp.float32)
        a = a + jnp.eye(n, dtype=jnp.float32)
        deg = jnp.sum(a, axis=1, keepdims=True)
        return a / deg

    return norm_adj(k1, n_hg), norm_adj(k2, n_gi), norm_adj(k3, num_groups)


# Pure-JAX reference of compute() (mirrors the kernel's bf16-matmul / f32-acc
# numerics so the tolerance check is tight).
def reference_compute(params, graphs, *, num_users, num_groups, layers):
    user_hg, gi_graph, gg_graph = graphs
    bf = jnp.bfloat16

    hg = jnp.concatenate(
        [params["user_embedding"], params["group_embedding"]], axis=0)
    acc = hg
    x = hg.astype(bf)
    A = user_hg.astype(bf)
    for _ in range(layers):
        h = jnp.dot(A, x, preferred_element_type=jnp.float32)
        acc = h + acc
        x = h.astype(bf)
    hg_mean = acc * (1.0 / float(layers + 1))
    hg_users, hg_groups = hg_mean[:num_users], hg_mean[num_users:]

    gi0 = jnp.concatenate(
        [params["group_embedding"], params["item_embedding"]], axis=0)
    gi = jnp.dot(gi_graph[:num_groups].astype(bf), gi0.astype(bf),
                 preferred_element_type=jnp.float32)
    gi_groups = gi[:num_groups]

    gg = jnp.dot(gg_graph.astype(bf), params["group_embedding"].astype(bf),
                 preferred_element_type=jnp.float32)

    def gate(x_, w, b):
        return jax.nn.sigmoid(x_ @ w + b)

    hyper = gate(hg_groups, params["hyper_gate_w"], params["hyper_gate_b"])
    light = gate(gi_groups, params["lightgcn_gate_w"], params["lightgcn_gate_b"])
    over = gate(gg, params["overlap_gate_w"], params["overlap_gate_b"])
    group_final = hyper * hg_groups + light * gi_groups + over * gg
    return hg_users, group_final


if __name__ == "__main__":
    num_users, num_items, num_groups = 32, 48, 16
    emb_dim, layers = 32, 2
    batch = 8

    key = jax.random.PRNGKey(0)
    k_params, k_graphs, k_u, k_p, k_n = jax.random.split(key, 5)

    params = make_params(k_params, num_users, num_items, num_groups, emb_dim)
    graphs = make_graphs(k_graphs, num_users, num_items, num_groups)

    # one-time graph preparation (pad + bf16 cast + group-row trim), hoisted
    # out of the per-forward hot path
    prepped = prepare_graphs(*graphs, num_users=num_users, num_groups=num_groups)
    prepped = jax.block_until_ready(prepped)

    user_inputs = jax.random.randint(k_u, (batch,), 0, num_users)
    pos_groups = jax.random.randint(k_p, (batch,), 0, num_groups)
    neg_groups = jax.random.randint(k_n, (batch,), 0, num_groups)

    outs = consrec_forward(params, prepped, user_inputs, pos_groups, neg_groups,
                           num_users=num_users, num_groups=num_groups,
                           layers=layers)
    outs = jax.block_until_ready(outs)

    # correctness sanity check against the pure-JAX reference
    ref_users, ref_groups = reference_compute(
        params, graphs, num_users=num_users, num_groups=num_groups,
        layers=layers)
    np.testing.assert_allclose(np.asarray(outs[0]),
                               np.asarray(ref_users[user_inputs]),
                               rtol=1e-4, atol=1e-5)
    np.testing.assert_allclose(np.asarray(outs[1]),
                               np.asarray(ref_groups[pos_groups]),
                               rtol=1e-4, atol=1e-5)
    np.testing.assert_allclose(np.asarray(outs[2]),
                               np.asarray(ref_groups[neg_groups]),
                               rtol=1e-4, atol=1e-5)

    print("KERNEL_OK")
</pallas_src>

<mosaic_0001>
module attributes {stable_mosaic.version = 11 : i64} {
  func.func @kernel(%arg0: i32, %arg1: i32, %arg2: memref<128x128xbf16, #tpu.memory_space<vmem>>, %arg3: memref<128x128xbf16, #tpu.memory_space<vmem>>, %arg4: memref<128x128xf32, #tpu.memory_space<vmem>>, %arg5: memref<128x128xbf16, #tpu.memory_space<vmem>>, %arg6: memref<128x128xf32, #tpu.memory_space<vmem>>) attributes {dimension_semantics = [#tpu.dimension_semantics<parallel>, #tpu.dimension_semantics<arbitrary>], iteration_bounds = array<i64: 1, 1>, scalar_prefetch = 0 : i64, scratch_operands = 0 : i64, tpu.core_type = #tpu.core_type<tc>, window_params = [{transform_indices = @transform_0, window_bounds = array<i64: 128, 128>}, {pipeline_mode = #tpu.pipeline_mode<synchronous>, transform_indices = @transform_1, window_bounds = array<i64: 128, 128>}, {transform_indices = @transform_2, window_bounds = array<i64: 128, 128>}, {transform_indices = @transform_3, window_bounds = array<i64: 128, 128>}, {transform_indices = @transform_4, window_bounds = array<i64: 128, 128>}]} {
    %c0_i32 = arith.constant 0 : i32
    %0 = arith.cmpi eq, %arg1, %c0_i32 : i32
    %1 = arith.extui %0 : i1 to i32
    %c0_i32_0 = arith.constant 0 : i32
    %2 = arith.cmpi ne, %1, %c0_i32_0 : i32
    scf.if %2 {
      %cst_10 = arith.constant 0.000000e+00 : f32
      %12 = vector.broadcast %cst_10 : f32 to vector<128x128xf32>
      %c0_11 = arith.constant 0 : index
      %c0_12 = arith.constant 0 : index
      %13 = vector.load %arg6[%c0_11, %c0_12] : memref<128x128xf32, #tpu.memory_space<vmem>>, vector<128x128xf32>
      tpu.vector_store %arg6[%c0_11, %c0_12], %12 {strides = array<i32>} : memref<128x128xf32, #tpu.memory_space<vmem>>, vector<128x128xf32>,
    } else {
    }
    %c0 = arith.constant 0 : index
    %c0_1 = arith.constant 0 : index
    %3 = vector.load %arg3[%c0, %c0_1] : memref<128x128xbf16, #tpu.memory_space<vmem>>, vector<128x128xbf16>
    %c0_2 = arith.constant 0 : index
    %c0_3 = arith.constant 0 : index
    %4 = vector.load %arg6[%c0_2, %c0_3] : memref<128x128xf32, #tpu.memory_space<vmem>>, vector<128x128xf32>
    %c0_4 = arith.constant 0 : index
    %c0_5 = arith.constant 0 : index
    %5 = vector.load %arg2[%c0_4, %c0_5] : memref<128x128xbf16, #tpu.memory_space<vmem>>, vector<128x128xbf16>
    %cst = arith.constant dense<0.000000e+00> : vector<128x128xf32>
    %6 = tpu.matmul %5, %3, %cst {dimension_numbers = #tpu.dot_dimension_numbers<[1], [0], [0], [1], [0, 0, 1, 1], [], []>} : vector<128x128xbf16>, vector<128x128xbf16>, vector<128x128xf32> -> vector<128x128xf32>
    %7 = arith.addf %4, %6 : vector<128x128xf32>
    %c0_6 = arith.constant 0 : index
    %c0_7 = arith.constant 0 : index
    %8 = vector.load %arg6[%c0_6, %c0_7] : memref<128x128xf32, #tpu.memory_space<vmem>>, vector<128x128xf32>
    tpu.vector_store %arg6[%c0_6, %c0_7], %7 {strides = array<i32>} : memref<128x128xf32, #tpu.memory_space<vmem>>, vector<128x128xf32>,
    %c0_i32_8 = arith.constant 0 : i32
    %9 = arith.cmpi eq, %arg1, %c0_i32_8 : i32
    %10 = arith.extui %9 : i1 to i32
    %c0_i32_9 = arith.constant 0 : i32
    %11 = arith.cmpi ne, %10, %c0_i32_9 : i32
    scf.if %11 {
      %c0_10 = arith.constant 0 : index
      %c0_11 = arith.constant 0 : index
      %12 = vector.load %arg6[%c0_10, %c0_11] : memref<128x128xf32, #tpu.memory_space<vmem>>, vector<128x128xf32>
      %13 = arith.truncf %12 : vector<128x128xf32> to vector<128x128xbf16>
      %c0_12 = arith.constant 0 : index
      %c0_13 = arith.constant 0 : index
      %14 = vector.load %arg5[%c0_12, %c0_13] : memref<128x128xbf16, #tpu.memory_space<vmem>>, vector<128x128xbf16>
      tpu.vector_store %arg5[%c0_12, %c0_13], %13 {strides = array<i32>} : memref<128x128xbf16, #tpu.memory_space<vmem>>, vector<128x128xbf16>,
      %c0_14 = arith.constant 0 : index
      %c0_15 = arith.constant 0 : index
      %15 = vector.load %arg4[%c0_14, %c0_15] : memref<128x128xf32, #tpu.memory_space<vmem>>, vector<128x128xf32>
      %16 = arith.addf %12, %15 : vector<128x128xf32>
      %c0_16 = arith.constant 0 : index
      %c0_17 = arith.constant 0 : index
      %17 = vector.load %arg6[%c0_16, %c0_17] : memref<128x128xf32, #tpu.memory_space<vmem>>, vector<128x128xf32>
      tpu.vector_store %arg6[%c0_16, %c0_17], %16 {strides = array<i32>} : memref<128x128xf32, #tpu.memory_space<vmem>>, vector<128x128xf32>,
    } else {
    }
    return
  }
  func.func @transform_0(%arg0: i32, %arg1: i32) -> (i32, i32) {
    %c0_i32 = arith.constant 0 : i32
    return %arg0, %arg1 : i32, i32
  }
  func.func @transform_1(%arg0: i32, %arg1: i32) -> (i32, i32) {
    %c0_i32 = arith.constant 0 : i32
    %c0_i32_0 = arith.constant 0 : i32
    %c0_i32_1 = arith.constant 0 : i32
    return %c0_i32, %c0_i32_0 : i32, i32
  }
  func.func @transform_2(%arg0: i32, %arg1: i32) -> (i32, i32) {
    %c0_i32 = arith.constant 0 : i32
    %c0_i32_0 = arith.constant 0 : i32
    return %arg0, %c0_i32 : i32, i32
  }
  func.func @transform_3(%arg0: i32, %arg1: i32) -> (i32, i32) {
    %c0_i32 = arith.constant 0 : i32
    %c0_i32_0 = arith.constant 0 : i32
    return %arg0, %c0_i32 : i32, i32
  }
  func.func @transform_4(%arg0: i32, %arg1: i32) -> (i32, i32) {
    %c0_i32 = arith.constant 0 : i32
    %c0_i32_0 = arith.constant 0 : i32
    return %arg0, %c0_i32 : i32, i32
  }
}

module attributes {stable_mosaic.version = 11 : i64} {
  func.func @kernel(%arg0: i32, %arg1: i32, %arg2: memref<128x128xbf16, #tpu.memory_space<vmem>>, %arg3: memref<128x128xbf16, #tpu.memory_space<vmem>>, %arg4: memref<128x128xf32, #tpu.memory_space<vmem>>, %arg5: memref<128x128xbf16, #tpu.memory_space<vmem>>, %arg6: memref<128x128xf32, #tpu.memory_space<vmem>>) attributes {dimension_semantics = [#tpu.dimension_semantics<parallel>, #tpu.dimension_semantics<arbitrary>], iteration_bounds = array<i64: 1, 1>, scalar_prefetch = 0 : i64, scratch_operands = 0 : i64, tpu.core_type = #tpu.core_type<tc>, window_params = [{transform_indices = @transform_0, window_bounds = array<i64: 128, 128>}, {pipeline_mode = #tpu.pipeline_mode<synchronous>, transform_indices = @transform_1, window_bounds = array<i64: 128, 128>}, {transform_indices = @transform_2, window_bounds = array<i64: 128, 128>}, {transform_indices = @transform_3, window_bounds = array<i64: 128, 128>}, {transform_indices = @transform_4, window_bounds = array<i64: 128, 128>}]} {
    %c0_i32 = arith.constant 0 : i32
    %0 = arith.cmpi eq, %arg1, %c0_i32 : i32
    %1 = arith.extui %0 : i1 to i32
    %c0_i32_0 = arith.constant 0 : i32
    %2 = arith.cmpi ne, %1, %c0_i32_0 : i32
    scf.if %2 {
      %cst_10 = arith.constant 0.000000e+00 : f32
      %12 = vector.broadcast %cst_10 : f32 to vector<128x128xf32>
      %c0_11 = arith.constant 0 : index
      %c0_12 = arith.constant 0 : index
      %13 = vector.load %arg6[%c0_11, %c0_12] : memref<128x128xf32, #tpu.memory_space<vmem>>, vector<128x128xf32>
      tpu.vector_store %arg6[%c0_11, %c0_12], %12 {strides = array<i32>} : memref<128x128xf32, #tpu.memory_space<vmem>>, vector<128x128xf32>,
    } else {
    }
    %c0 = arith.constant 0 : index
    %c0_1 = arith.constant 0 : index
    %3 = vector.load %arg3[%c0, %c0_1] : memref<128x128xbf16, #tpu.memory_space<vmem>>, vector<128x128xbf16>
    %c0_2 = arith.constant 0 : index
    %c0_3 = arith.constant 0 : index
    %4 = vector.load %arg6[%c0_2, %c0_3] : memref<128x128xf32, #tpu.memory_space<vmem>>, vector<128x128xf32>
    %c0_4 = arith.constant 0 : index
    %c0_5 = arith.constant 0 : index
    %5 = vector.load %arg2[%c0_4, %c0_5] : memref<128x128xbf16, #tpu.memory_space<vmem>>, vector<128x128xbf16>
    %cst = arith.constant dense<0.000000e+00> : vector<128x128xf32>
    %6 = tpu.matmul %5, %3, %cst {dimension_numbers = #tpu.dot_dimension_numbers<[1], [0], [0], [1], [0, 0, 1, 1], [], []>} : vector<128x128xbf16>, vector<128x128xbf16>, vector<128x128xf32> -> vector<128x128xf32>
    %7 = arith.addf %4, %6 : vector<128x128xf32>
    %c0_6 = arith.constant 0 : index
    %c0_7 = arith.constant 0 : index
    %8 = vector.load %arg6[%c0_6, %c0_7] : memref<128x128xf32, #tpu.memory_space<vmem>>, vector<128x128xf32>
    tpu.vector_store %arg6[%c0_6, %c0_7], %7 {strides = array<i32>} : memref<128x128xf32, #tpu.memory_space<vmem>>, vector<128x128xf32>,
    %c0_i32_8 = arith.constant 0 : i32
    %9 = arith.cmpi eq, %arg1, %c0_i32_8 : i32
    %10 = arith.extui %9 : i1 to i32
    %c0_i32_9 = arith.constant 0 : i32
    %11 = arith.cmpi ne, %10, %c0_i32_9 : i32
    scf.if %11 {
      %c0_10 = arith.constant 0 : index
      %c0_11 = arith.constant 0 : index
      %12 = vector.load %arg6[%c0_10, %c0_11] : memref<128x128xf32, #tpu.memory_space<vmem>>, vector<128x128xf32>
      %13 = arith.truncf %12 : vector<128x128xf32> to vector<128x128xbf16>
      %c0_12 = arith.constant 0 : index
      %c0_13 = arith.constant 0 : index
      %14 = vector.load %arg5[%c0_12, %c0_13] : memref<128x128xbf16, #tpu.memory_space<vmem>>, vector<128x128xbf16>
      tpu.vector_store %arg5[%c0_12, %c0_13], %13 {strides = array<i32>} : memref<128x128xbf16, #tpu.memory_space<vmem>>, vector<128x128xbf16>,
      %c0_14 = arith.constant 0 : index
      %c0_15 = arith.constant 0 : index
      %15 = vector.load %arg4[%c0_14, %c0_15] : memref<128x128xf32, #tpu.memory_space<vmem>>, vector<128x128xf32>
      %16 = arith.addf %12, %15 : vector<128x128xf32>
      %c0_16 = arith.constant 0 : index
      %c0_17 = arith.constant 0 : index
      %17 = vector.load %arg6[%c0_16, %c0_17] : memref<128x128xf32, #tpu.memory_space<vmem>>, vector<128x128xf32>
      tpu.vector_store %arg6[%c0_16, %c0_17], %16 {strides = array<i32>} : memref<128x128xf32, #tpu.memory_space<vmem>>, vector<128x128xf32>,
    } else {
    }
    return
  }
  func.func @transform_0(%arg0: i32, %arg1: i32) -> (i32, i32) {
    %c0_i32 = arith.constant 0 : i32
    return %arg0, %arg1 : i32, i32
  }
  func.func @transform_1(%arg0: i32, %arg1: i32) -> (i32, i32) {
    %c0_i32 = arith.constant 0 : i32
    %c0_i32_0 = arith.constant 0 : i32
    %c0_i32_1 = arith.constant 0 : i32
    return %c0_i32, %c0_i32_0 : i32, i32
  }
  func.func @transform_2(%arg0: i32, %arg1: i32) -> (i32, i32) {
    %c0_i32 = arith.constant 0 : i32
    %c0_i32_0 = arith.constant 0 : i32
    return %arg0, %c0_i32 : i32, i32
  }
  func.func @transform_3(%arg0: i32, %arg1: i32) -> (i32, i32) {
    %c0_i32 = arith.constant 0 : i32
    %c0_i32_0 = arith.constant 0 : i32
    return %arg0, %c0_i32 : i32, i32
  }
  func.func @transform_4(%arg0: i32, %arg1: i32) -> (i32, i32) {
    %c0_i32 = arith.constant 0 : i32
    %c0_i32_0 = arith.constant 0 : i32
    return %arg0, %c0_i32 : i32, i32
  }
}

module attributes {stable_mosaic.version = 11 : i64} {
  func.func @kernel(%arg0: i32, %arg1: i32, %arg2: memref<128x128xbf16, #tpu.memory_space<vmem>>, %arg3: memref<128x128xbf16, #tpu.memory_space<vmem>>, %arg4: memref<128x128xf32, #tpu.memory_space<vmem>>) attributes {dimension_semantics = [#tpu.dimension_semantics<parallel>, #tpu.dimension_semantics<arbitrary>], iteration_bounds = array<i64: 1, 1>, scalar_prefetch = 0 : i64, scratch_operands = 0 : i64, tpu.core_type = #tpu.core_type<tc>, window_params = [{transform_indices = @transform_0, window_bounds = array<i64: 128, 128>}, {pipeline_mode = #tpu.pipeline_mode<synchronous>, transform_indices = @transform_1, window_bounds = array<i64: 128, 128>}, {transform_indices = @transform_2, window_bounds = array<i64: 128, 128>}]} {
    %c0_i32 = arith.constant 0 : i32
    %0 = arith.cmpi eq, %arg1, %c0_i32 : i32
    %1 = arith.extui %0 : i1 to i32
    %c0_i32_0 = arith.constant 0 : i32
    %2 = arith.cmpi ne, %1, %c0_i32_0 : i32
    scf.if %2 {
      %cst_8 = arith.constant 0.000000e+00 : f32
      %9 = vector.broadcast %cst_8 : f32 to vector<128x128xf32>
      %c0_9 = arith.constant 0 : index
      %c0_10 = arith.constant 0 : index
      %10 = vector.load %arg4[%c0_9, %c0_10] : memref<128x128xf32, #tpu.memory_space<vmem>>, vector<128x128xf32>
      tpu.vector_store %arg4[%c0_9, %c0_10], %9 {strides = array<i32>} : memref<128x128xf32, #tpu.memory_space<vmem>>, vector<128x128xf32>,
    } else {
    }
    %c0 = arith.constant 0 : index
    %c0_1 = arith.constant 0 : index
    %3 = vector.load %arg3[%c0, %c0_1] : memref<128x128xbf16, #tpu.memory_space<vmem>>, vector<128x128xbf16>
    %c0_2 = arith.constant 0 : index
    %c0_3 = arith.constant 0 : index
    %4 = vector.load %arg4[%c0_2, %c0_3] : memref<128x128xf32, #tpu.memory_space<vmem>>, vector<128x128xf32>
    %c0_4 = arith.constant 0 : index
    %c0_5 = arith.constant 0 : index
    %5 = vector.load %arg2[%c0_4, %c0_5] : memref<128x128xbf16, #tpu.memory_space<vmem>>, vector<128x128xbf16>
    %cst = arith.constant dense<0.000000e+00> : vector<128x128xf32>
    %6 = tpu.matmul %5, %3, %cst {dimension_numbers = #tpu.dot_dimension_numbers<[1], [0], [0], [1], [0, 0, 1, 1], [], []>} : vector<128x128xbf16>, vector<128x128xbf16>, vector<128x128xf32> -> vector<128x128xf32>
    %7 = arith.addf %4, %6 : vector<128x128xf32>
    %c0_6 = arith.constant 0 : index
    %c0_7 = arith.constant 0 : index
    %8 = vector.load %arg4[%c0_6, %c0_7] : memref<128x128xf32, #tpu.memory_space<vmem>>, vector<128x128xf32>
    tpu.vector_store %arg4[%c0_6, %c0_7], %7 {strides = array<i32>} : memref<128x128xf32, #tpu.memory_space<vmem>>, vector<128x128xf32>,
    return
  }
  func.func @transform_0(%arg0: i32, %arg1: i32) -> (i32, i32) {
    %c0_i32 = arith.constant 0 : i32
    return %arg0, %arg1 : i32, i32
  }
  func.func @transform_1(%arg0: i32, %arg1: i32) -> (i32, i32) {
    %c0_i32 = arith.constant 0 : i32
    %c0_i32_0 = arith.constant 0 : i32
    %c0_i32_1 = arith.constant 0 : i32
    return %c0_i32, %c0_i32_0 : i32, i32
  }
  func.func @transform_2(%arg0: i32, %arg1: i32) -> (i32, i32) {
    %c0_i32 = arith.constant 0 : i32
    %c0_i32_0 = arith.constant 0 : i32
    return %arg0, %c0_i32 : i32, i32
  }
}

module attributes {stable_mosaic.version = 11 : i64} {
  func.func @_fuse_kernel(%arg0: i32, %arg1: memref<128x128xf32, #tpu.memory_space<vmem>>, %arg2: memref<128x128xf32, #tpu.memory_space<vmem>>, %arg3: memref<128x128xf32, #tpu.memory_space<vmem>>, %arg4: memref<8x128xf32, #tpu.memory_space<vmem>>, %arg5: memref<3xf32, #tpu.memory_space<smem>>, %arg6: memref<128x128xf32, #tpu.memory_space<vmem>>) attributes {dimension_semantics = [#tpu.dimension_semantics<parallel>], iteration_bounds = array<i64: 1>, scalar_prefetch = 0 : i64, scratch_operands = 0 : i64, tpu.core_type = #tpu.core_type<tc>, window_params = [{transform_indices = @transform_0, window_bounds = array<i64: 128, 128>}, {transform_indices = @transform_1, window_bounds = array<i64: 128, 128>}, {transform_indices = @transform_2, window_bounds = array<i64: 128, 128>}, {pipeline_mode = #tpu.pipeline_mode<synchronous>, transform_indices = @transform_3, window_bounds = array<i64: 8, 128>}, {transform_indices = @transform_4, window_bounds = array<i64: 3>}, {transform_indices = @transform_5, window_bounds = array<i64: 128, 128>}]} {
    %c0 = arith.constant 0 : index
    %c0_0 = arith.constant 0 : index
    %0 = vector.load %arg1[%c0, %c0_0] : memref<128x128xf32, #tpu.memory_space<vmem>>, vector<128x128xf32>
    %c0_1 = arith.constant 0 : index
    %c0_2 = arith.constant 0 : index
    %1 = vector.load %arg2[%c0_1, %c0_2] : memref<128x128xf32, #tpu.memory_space<vmem>>, vector<128x128xf32>
    %c0_3 = arith.constant 0 : index
    %c0_4 = arith.constant 0 : index
    %2 = vector.load %arg3[%c0_3, %c0_4] : memref<128x128xf32, #tpu.memory_space<vmem>>, vector<128x128xf32>
    %c0_5 = arith.constant 0 : index
    %c0_6 = arith.constant 0 : index
    %3 = vector.load %arg4[%c0_5, %c0_6] : memref<8x128xf32, #tpu.memory_space<vmem>>, vector<8x128xf32>
    %4 = vector.extract_strided_slice %3 {offsets = [0, 0], sizes = [1, 128], strides = [1, 1]} : vector<8x128xf32> to vector<1x128xf32>
    %5 = vector.broadcast %4 : vector<1x128xf32> to vector<128x128xf32>
    %6 = arith.mulf %0, %5 : vector<128x128xf32>
    %cst = arith.constant dense<0.000000e+00> : vector<128xf32>
    %7 = vector.multi_reduction <add>, %6, %cst [1] : vector<128x128xf32> to vector<128xf32>
    %8 = vector.shape_cast %7 : vector<128xf32> to vector<128x1xf32>
    %c0_7 = arith.constant 0 : index
    %9 = memref.load %arg5[%c0_7] : memref<3xf32, #tpu.memory_space<smem>>
    %10 = vector.broadcast %9 : f32 to vector<128x1xf32>
    %11 = arith.addf %8, %10 : vector<128x1xf32>
    %12 = arith.negf %11 : vector<128x1xf32>
    %13 = math.exp %12 : vector<128x1xf32>
    %cst_8 = arith.constant 1.000000e+00 : f32
    %14 = vector.broadcast %cst_8 : f32 to vector<128x1xf32>
    %15 = arith.addf %14, %13 : vector<128x1xf32>
    %16 = arith.divf %14, %15 : vector<128x1xf32>
    %17 = vector.broadcast %16 : vector<128x1xf32> to vector<128x128xf32>
    %18 = arith.mulf %17, %0 : vector<128x128xf32>
    %19 = vector.extract_strided_slice %3 {offsets = [1, 0], sizes = [1, 128], strides = [1, 1]} : vector<8x128xf32> to vector<1x128xf32>
    %20 = vector.broadcast %19 : vector<1x128xf32> to vector<128x128xf32>
    %21 = arith.mulf %1, %20 : vector<128x128xf32>
    %cst_9 = arith.constant dense<0.000000e+00> : vector<128xf32>
    %22 = vector.multi_reduction <add>, %21, %cst_9 [1] : vector<128x128xf32> to vector<128xf32>
    %23 = vector.shape_cast %22 : vector<128xf32> to vector<128x1xf32>
    %c1 = arith.constant 1 : index
    %24 = memref.load %arg5[%c1] : memref<3xf32, #tpu.memory_space<smem>>
    %25 = vector.broadcast %24 : f32 to vector<128x1xf32>
    %26 = arith.addf %23, %25 : vector<128x1xf32>
    %27 = arith.negf %26 : vector<128x1xf32>
    %28 = math.exp %27 : vector<128x1xf32>
    %cst_10 = arith.constant 1.000000e+00 : f32
    %29 = vector.broadcast %cst_10 : f32 to vector<128x1xf32>
    %30 = arith.addf %29, %28 : vector<128x1xf32>
    %31 = arith.divf %29, %30 : vector<128x1xf32>
    %32 = vector.broadcast %31 : vector<128x1xf32> to vector<128x128xf32>
    %33 = arith.mulf %32, %1 : vector<128x128xf32>
    %34 = arith.addf %18, %33 : vector<128x128xf32>
    %35 = vector.extract_strided_slice %3 {offsets = [2, 0], sizes = [1, 128], strides = [1, 1]} : vector<8x128xf32> to vector<1x128xf32>
    %36 = vector.broadcast %35 : vector<1x128xf32> to vector<128x128xf32>
    %37 = arith.mulf %2, %36 : vector<128x128xf32>
    %cst_11 = arith.constant dense<0.000000e+00> : vector<128xf32>
    %38 = vector.multi_reduction <add>, %37, %cst_11 [1] : vector<128x128xf32> to vector<128xf32>
    %39 = vector.shape_cast %38 : vector<128xf32> to vector<128x1xf32>
    %c2 = arith.constant 2 : index
    %40 = memref.load %arg5[%c2] : memref<3xf32, #tpu.memory_space<smem>>
    %41 = vector.broadcast %40 : f32 to vector<128x1xf32>
    %42 = arith.addf %39, %41 : vector<128x1xf32>
    %43 = arith.negf %42 : vector<128x1xf32>
    %44 = math.exp %43 : vector<128x1xf32>
    %cst_12 = arith.constant 1.000000e+00 : f32
    %45 = vector.broadcast %cst_12 : f32 to vector<128x1xf32>
    %46 = arith.addf %45, %44 : vector<128x1xf32>
    %47 = arith.divf %45, %46 : vector<128x1xf32>
    %48 = vector.broadcast %47 : vector<128x1xf32> to vector<128x128xf32>
    %49 = arith.mulf %48, %2 : vector<128x128xf32>
    %50 = arith.addf %34, %49 : vector<128x128xf32>
    %c0_13 = arith.constant 0 : index
    %c0_14 = arith.constant 0 : index
    %51 = vector.load %arg6[%c0_13, %c0_14] : memref<128x128xf32, #tpu.memory_space<vmem>>, vector<128x128xf32>
    tpu.vector_store %arg6[%c0_13, %c0_14], %50 {strides = array<i32>} : memref<128x128xf32, #tpu.memory_space<vmem>>, vector<128x128xf32>,
    return
  }
  func.func @transform_0(%arg0: i32) -> (i32, i32) {
    %c0_i32 = arith.constant 0 : i32
    %c0_i32_0 = arith.constant 0 : i32
    return %arg0, %c0_i32 : i32, i32
  }
  func.func @transform_1(%arg0: i32) -> (i32, i32) {
    %c0_i32 = arith.constant 0 : i32
    %c0_i32_0 = arith.constant 0 : i32
    return %arg0, %c0_i32 : i32, i32
  }
  func.func @transform_2(%arg0: i32) -> (i32, i32) {
    %c0_i32 = arith.constant 0 : i32
    %c0_i32_0 = arith.constant 0 : i32
    return %arg0, %c0_i32 : i32, i32
  }
  func.func @transform_3(%arg0: i32) -> (i32, i32) {
    %c0_i32 = arith.constant 0 : i32
    %c0_i32_0 = arith.constant 0 : i32
    %c0_i32_1 = arith.constant 0 : i32
    return %c0_i32, %c0_i32_0 : i32, i32
  }
  func.func @transform_4(%arg0: i32) -> i32 {
    %c0_i32 = arith.constant 0 : i32
    %c0_i32_0 = arith.constant 0 : i32
    return %c0_i32 : i32
  }
  func.func @transform_5(%arg0: i32) -> (i32, i32) {
    %c0_i32 = arith.constant 0 : i32
    %c0_i32_0 = arith.constant 0 : i32
    return %arg0, %c0_i32 : i32, i32
  }
}

</mosaic_0001>

<bundles_post_ra>
// kernel: consrec_forward.5
= control target key start
LH: loop header
LB: loop body
LE: loop exit
PB: predicated region body
PF: predicated region fallthrough
CT: control target
= control target key end

     0   :  { %s834_s1 = inlined_call_operand.vmem [shape: bf16[128,128], index: 1, kind: input, shape index: {}]   ;;  %s835_s0 = inlined_call_operand.vmem [shape: bf16[128,128], index: 0, kind: input, shape index: {}]   ;;  %s836_s2 = inlined_call_operand.vmem [shape: f32[128,128], index: 2, kind: input, shape index: {}]   ;;  %s837_s4 = inlined_call_operand.vmem [shape: f32[128,128], index: 4, kind: output, shape index: {1}]   ;;  %s838_s3 = inlined_call_operand.vmem [shape: bf16[128,128], index: 3, kind: output, shape index: {0}]  }
   0x1   :  { %v625_v0 = vld [vmem:[%s834_s1] sm:$0xff]   ;;  %v626_v1 = vld [vmem:[%s834_s1 + $0x8] sm:$0xff]   ;;  %v627_v2 = vld [vmem:[%s834_s1 + $0x10] sm:$0xff]  }
   0x2   :  { %576 = vmatprep.subr.bf16.mxu0 %v625_v0  ;;  %608 = vmatprep.subr.bf16.mxu1 %v625_v0  ;;  %v628_v3 = vld [vmem:[%s834_s1 + $0x18] sm:$0xff]   ;;  %v633_v4 = vld [vmem:[%s835_s0] sm:$0xff]   ;;  %v630_v7 = vld [vmem:[%s834_s1 + $0x28] sm:$0xff]  }
   0x3   :  { %577 = vmatpush3.bf16.msra.mxu0 %v625_v0  ;;  %616 = vmatpush3.bf16.msra.mxu1 %v625_v0  ;;  %v634_v5 = vld [vmem:[%s835_s0 + $0x20] sm:$0xff]   ;;  %v631_v8 = vld [vmem:[%s834_s1 + $0x30] sm:$0xff]   ;;  %v632_v9 = vld [vmem:[%s834_s1 + $0x38] sm:$0xff]  }
   0x4   :  { %578 = vmatprep.subr.bf16.mxu0 %v626_v1  ;;  %609 = vmatprep.subr.bf16.mxu1 %v626_v1  ;;  %v629_v6 = vld [vmem:[%s834_s1 + $0x20] sm:$0xff]   ;;  %v635_v10 = vld [vmem:[%s835_s0 + $0x8] sm:$0xff]   ;;  %v637_v12 = vld [vmem:[%s835_s0 + $0x10] sm:$0xff]  }
   0x5   :  { %592 = vmatprep.mubr.bf16.mxu0 %v633_v4  ;;  %600 = vmatprep.mubr.bf16.mxu1 %v634_v5  ;;  %v636_v11 = vld [vmem:[%s835_s0 + $0x28] sm:$0xff]   ;;  %v638_v13 = vld [vmem:[%s835_s0 + $0x30] sm:$0xff]   ;;  %v639_v14 = vld [vmem:[%s835_s0 + $0x18] sm:$0xff]  }
   0x6   :  { %v640_v15 = vld [vmem:[%s835_s0 + $0x38] sm:$0xff]   ;;  %v411_v17 = vld [vmem:[%s836_s2 + $0x10] sm:$0xff]  ;;  %v409_v21 = vld [vmem:[%s836_s2] sm:$0xff] }
   0x7   :  { %579 = vmatpush3.bf16.msra.mxu0 %v626_v1  ;;  %617 = vmatpush3.bf16.msra.mxu1 %v626_v1  ;;  %v419_v19 = vld [vmem:[%s836_s2 + $0x50] sm:$0xff]  ;;  %v417_v23 = vld [vmem:[%s836_s2 + $0x40] sm:$0xff]  ;;  %v412_v25 = vld [vmem:[%s836_s2 + $0x18] sm:$0xff] }
   0x8   :  { %580 = vmatprep.subr.bf16.mxu0 %v627_v2  ;;  %610 = vmatprep.subr.bf16.mxu1 %v627_v2  ;;  %v420_v27 = vld [vmem:[%s836_s2 + $0x58] sm:$0xff]  ;;  %v410_v31 = vld [vmem:[%s836_s2 + $0x8] sm:$0xff]  ;;  %v415_v45 = vld [vmem:[%s836_s2 + $0x30] sm:$0xff] }
   0x9   :  { %v418_v33 = vld [vmem:[%s836_s2 + $0x48] sm:$0xff]  ;;  %v423_v47 = vld [vmem:[%s836_s2 + $0x70] sm:$0xff]  ;;  %v413_v49 = vld [vmem:[%s836_s2 + $0x20] sm:$0xff] }
   0xa   :  { %v421_v51 = vld [vmem:[%s836_s2 + $0x60] sm:$0xff]  ;;  %v416_v53 = vld [vmem:[%s836_s2 + $0x38] sm:$0xff]  ;;  %v414_v59 = vld [vmem:[%s836_s2 + $0x28] sm:$0xff] }
   0xb   :  { %581 = vmatpush3.bf16.msra.mxu0 %v627_v2  ;;  %618 = vmatpush3.bf16.msra.mxu1 %v627_v2  ;;  %v424_v55 = vld [vmem:[%s836_s2 + $0x78] sm:$0xff]  ;;  %v422_v61 = vld [vmem:[%s836_s2 + $0x68] sm:$0xff] }
   0xc   :  { %582 = vmatprep.subr.bf16.mxu0 %v628_v3  ;;  %611 = vmatprep.subr.bf16.mxu1 %v628_v3 }
   0xf   :  { %583 = vmatpush3.bf16.msra.mxu0 %v628_v3  ;;  %619 = vmatpush3.bf16.msra.mxu1 %v628_v3 }
  0x10   :  { %584 = vmatprep.subr.bf16.mxu0 %v629_v6  ;;  %612 = vmatprep.subr.bf16.mxu1 %v629_v6 }
  0x13   :  { %585 = vmatpush3.bf16.msra.mxu0 %v629_v6  ;;  %620 = vmatpush3.bf16.msra.mxu1 %v629_v6 }
  0x14   :  { %586 = vmatprep.subr.bf16.mxu0 %v630_v7  ;;  %613 = vmatprep.subr.bf16.mxu1 %v630_v7 }
  0x17   :  { %587 = vmatpush3.bf16.msra.mxu0 %v630_v7  ;;  %621 = vmatpush3.bf16.msra.mxu1 %v630_v7 }
  0x18   :  { %588 = vmatprep.subr.bf16.mxu0 %v631_v8  ;;  %614 = vmatprep.subr.bf16.mxu1 %v631_v8 }
  0x1b   :  { %589 = vmatpush3.bf16.msra.mxu0 %v631_v8  ;;  %622 = vmatpush3.bf16.msra.mxu1 %v631_v8 }
  0x1c   :  { %590 = vmatprep.subr.bf16.mxu0 %v632_v9  ;;  %615 = vmatprep.subr.bf16.mxu1 %v632_v9 }
  0x1f   :  { %591 = vmatpush3.bf16.msra.mxu0 %v632_v9  ;;  %623 = vmatpush3.bf16.msra.mxu1 %v632_v9 }
  0x22   :  { %593 = vmatmul.mubr.bf16.vlgmr.msra.gmra.mrb[0].mxu0 %v635_v10  ;;  %601 = vmatmul.mubr.bf16.vlgmr.msra.gmra.mrb[0].mxu1 %v636_v11 }
  0x23   :  { %596 = vmatprep.mubr.bf16.mxu0 %v637_v12  ;;  %604 = vmatprep.mubr.bf16.mxu1 %v638_v13 }
  0x2a   :  { %597 = vmatmul.mubr.bf16.gmra.mrb[4].mxu0 %v639_v14  ;;  %605 = vmatmul.mubr.bf16.gmra.mrb[4].mxu1 %v640_v15 }
  0xf5   :  { %v594_v16 = vpop.f32.mrb[0].mxu0  ;;  %v602_v18 = vpop.f32.mrb[0].mxu1 }
  0xf6   :  { %v215_v20 = vpop.f32.mrb[1].mxu0  ;;  %v247_v22 = vpop.f32.mrb[1].mxu1  ;;  %v427_v28 = vadd.f32 %v594_v16, %v411_v17  ;;  %v435_v29 = vadd.f32 %v602_v18, %v419_v19 }
  0xf7   :  { %v595_v24 = vpop.f32.mrb[2].mxu0  ;;  %v603_v26 = vpop.f32.mrb[2].mxu1  ;;  %v425_v34 = vadd.f32 %v409_v21, %v215_v20  ;;  %v433_v35 = vadd.f32 %v417_v23, %v247_v22 }
  0xf8   :  { %v218_v30 = vpop.f32.mrb[3].mxu0  ;;  %v250_v32 = vpop.f32.mrb[3].mxu1  ;;  %443 = vst [vmem:[%s837_s4 + $0x10] sm:$0xff] %v427_v28  ;;  %451 = vst [vmem:[%s837_s4 + $0x50] sm:$0xff] %v435_v29  ;;  %v521_v36 = vpack.c.bf16 %v595_v24, %v594_v16  ;;  %v428_v37 = vadd.f32 %v595_v24, %v412_v25  ;;  %v541_v38 = vpack.c.bf16 %v603_v26, %v602_v18 }
  0xf9   :  { %v436_v39 = vadd.f32 %v603_v26, %v420_v27  ;;  %441 = vst [vmem:[%s837_s4] sm:$0xff] %v425_v34  ;;  %449 = vst [vmem:[%s837_s4 + $0x40] sm:$0xff] %v433_v35  ;;  %v516_v40 = vpack.c.bf16 %v218_v30, %v215_v20  ;;  %v426_v41 = vadd.f32 %v410_v31, %v218_v30 }
  0xfa   :  { %v536_v42 = vpack.c.bf16 %v250_v32, %v247_v22  ;;  %v434_v43 = vadd.f32 %v418_v33, %v250_v32  ;;  %553 = vst [vmem:[%s838_s3 + $0x8] sm:$0xff] %v521_v36   ;;  %444 = vst [vmem:[%s837_s4 + $0x18] sm:$0xff] %v428_v37 }
  0xfb   :  { %557 = vst [vmem:[%s838_s3 + $0x28] sm:$0xff] %v541_v38   ;;  %452 = vst [vmem:[%s837_s4 + $0x58] sm:$0xff] %v436_v39 }
  0xfc   :  { %517 = vst [vmem:[%s838_s3] sm:$0xff] %v516_v40   ;;  %442 = vst [vmem:[%s837_s4 + $0x8] sm:$0xff] %v426_v41 }
  0xfd   :  { %556 = vst [vmem:[%s838_s3 + $0x20] sm:$0xff] %v536_v42   ;;  %450 = vst [vmem:[%s837_s4 + $0x48] sm:$0xff] %v434_v43  ;;  %v598_v44 = vpop.f32.mrb[4].mxu0  ;;  %v606_v46 = vpop.f32.mrb[4].mxu1 }
  0xfe   :  { %v231_v48 = vpop.f32.mrb[5].mxu0  ;;  %v263_v50 = vpop.f32.mrb[5].mxu1  ;;  %v431_v56 = vadd.f32 %v598_v44, %v415_v45  ;;  %v439_v57 = vadd.f32 %v606_v46, %v423_v47 }
  0xff   :  { %v599_v52 = vpop.f32.mrb[6].mxu0  ;;  %v607_v54 = vpop.f32.mrb[6].mxu1  ;;  %v429_v62 = vadd.f32 %v413_v49, %v231_v48  ;;  %v437_v63 = vadd.f32 %v421_v51, %v263_v50 }
 0x100   :  { %v234_v58 = vpop.f32.mrb[7].mxu0  ;;  %v266_v60 = vpop.f32.mrb[7].mxu1  ;;  %447 = vst [vmem:[%s837_s4 + $0x30] sm:$0xff] %v431_v56  ;;  %455 = vst [vmem:[%s837_s4 + $0x70] sm:$0xff] %v439_v57  ;;  %v531_v0 = vpack.c.bf16 %v599_v52, %v598_v44  ;;  %v432_v1 = vadd.f32 %v599_v52, %v416_v53  ;;  %v551_v2 = vpack.c.bf16 %v607_v54, %v606_v46 }
 0x101   :  { %v440_v3 = vadd.f32 %v607_v54, %v424_v55  ;;  %445 = vst [vmem:[%s837_s4 + $0x20] sm:$0xff] %v429_v62  ;;  %453 = vst [vmem:[%s837_s4 + $0x60] sm:$0xff] %v437_v63  ;;  %v526_v4 = vpack.c.bf16 %v234_v58, %v231_v48  ;;  %v430_v5 = vadd.f32 %v414_v59, %v234_v58 }
 0x102   :  { %v546_v6 = vpack.c.bf16 %v266_v60, %v263_v50  ;;  %v438_v7 = vadd.f32 %v422_v61, %v266_v60  ;;  %555 = vst [vmem:[%s838_s3 + $0x18] sm:$0xff] %v531_v0   ;;  %448 = vst [vmem:[%s837_s4 + $0x38] sm:$0xff] %v432_v1 }
 0x103   :  { %559 = vst [vmem:[%s838_s3 + $0x38] sm:$0xff] %v551_v2   ;;  %456 = vst [vmem:[%s837_s4 + $0x78] sm:$0xff] %v440_v3 }
 0x104   :  { %554 = vst [vmem:[%s838_s3 + $0x10] sm:$0xff] %v526_v4   ;;  %446 = vst [vmem:[%s837_s4 + $0x28] sm:$0xff] %v430_v5 }
 0x105   :  { %558 = vst [vmem:[%s838_s3 + $0x30] sm:$0xff] %v546_v6   ;;  %454 = vst [vmem:[%s837_s4 + $0x68] sm:$0xff] %v438_v7 }

// kernel: consrec_forward.6
= control target key start
LH: loop header
LB: loop body
LE: loop exit
PB: predicated region body
PF: predicated region fallthrough
CT: control target
= control target key end

     0   :  { %s872_s0 = inlined_call_operand.vmem [shape: bf16[128,128], index: 0, kind: input, shape index: {}]   ;;  %s873_s1 = inlined_call_operand.vmem [shape: bf16[128,128], index: 1, kind: input, shape index: {}]   ;;  %s874_s2 = inlined_call_operand.vmem [shape: f32[128,128], index: 2, kind: input, shape index: {}]   ;;  %s875_s3 = inlined_call_operand.hbm [shape: bf16[128,128], index: 3, kind: output, shape index: {0}]   ;;  %s876_s4 = inlined_call_operand.vmem [shape: f32[128,128], index: 4, kind: output, shape index: {1}]  }
   0x1   :  { %v641_v0 = vld [vmem:[%s873_s1] sm:$0xff]   ;;  %v642_v1 = vld [vmem:[%s873_s1 + $0x8] sm:$0xff]   ;;  %v643_v2 = vld [vmem:[%s873_s1 + $0x10] sm:$0xff]  }
   0x2   :  { %589 = vmatprep.subr.bf16.mxu0 %v641_v0  ;;  %621 = vmatprep.subr.bf16.mxu1 %v641_v0  ;;  %v644_v3 = vld [vmem:[%s873_s1 + $0x18] sm:$0xff]   ;;  %v649_v4 = vld [vmem:[%s872_s0] sm:$0xff]   ;;  %v646_v7 = vld [vmem:[%s873_s1 + $0x28] sm:$0xff]  }
   0x3   :  { %590 = vmatpush3.bf16.msra.mxu0 %v641_v0  ;;  %629 = vmatpush3.bf16.msra.mxu1 %v641_v0  ;;  %v650_v5 = vld [vmem:[%s872_s0 + $0x20] sm:$0xff]  }
   0x4   :  { %591 = vmatprep.subr.bf16.mxu0 %v642_v1  ;;  %622 = vmatprep.subr.bf16.mxu1 %v642_v1  ;;  %v645_v6 = vld [vmem:[%s873_s1 + $0x20] sm:$0xff]  }
   0x5   :  { %605 = vmatprep.mubr.bf16.mxu0 %v649_v4  ;;  %613 = vmatprep.mubr.bf16.mxu1 %v650_v5 }
   0x7   :  { %592 = vmatpush3.bf16.msra.mxu0 %v642_v1  ;;  %630 = vmatpush3.bf16.msra.mxu1 %v642_v1 }
   0x8   :  { %593 = vmatprep.subr.bf16.mxu0 %v643_v2  ;;  %623 = vmatprep.subr.bf16.mxu1 %v643_v2 }
   0xb   :  { %594 = vmatpush3.bf16.msra.mxu0 %v643_v2  ;;  %631 = vmatpush3.bf16.msra.mxu1 %v643_v2 }
   0xc   :  { %595 = vmatprep.subr.bf16.mxu0 %v644_v3  ;;  %624 = vmatprep.subr.bf16.mxu1 %v644_v3 }
   0xf   :  { %596 = vmatpush3.bf16.msra.mxu0 %v644_v3  ;;  %632 = vmatpush3.bf16.msra.mxu1 %v644_v3 }
  0x10   :  { %597 = vmatprep.subr.bf16.mxu0 %v645_v6  ;;  %625 = vmatprep.subr.bf16.mxu1 %v645_v6 }
  0x11   :  { %10 = vsyncpa [#allocation3], 0  ;;  %v647_v8 = vld [vmem:[%s873_s1 + $0x30] sm:$0xff]   ;;  %v648_v9 = vld [vmem:[%s873_s1 + $0x38] sm:$0xff]   ;;  %s681_s9 = smov [#allocation2]  }
  0x12   :  { %v651_v10 = vld [vmem:[%s872_s0 + $0x8] sm:$0xff]   ;;  %v653_v12 = vld [vmem:[%s872_s0 + $0x10] sm:$0xff]   ;;  %v655_v14 = vld [vmem:[%s872_s0 + $0x18] sm:$0xff]   ;;  %s463_s10 = sshll.u32 %s681_s9, 4  ;;  %s835_s10 = int_to_ptr.vmem [resolvable:$true] %s463_s10 }
  0x13   :  { %598 = vmatpush3.bf16.msra.mxu0 %v645_v6  ;;  %633 = vmatpush3.bf16.msra.mxu1 %v645_v6  ;;  %v652_v11 = vld [vmem:[%s872_s0 + $0x28] sm:$0xff]   ;;  %v654_v13 = vld [vmem:[%s872_s0 + $0x30] sm:$0xff]   ;;  %v656_v15 = vld [vmem:[%s872_s0 + $0x38] sm:$0xff]   ;;  %s657_s28 = scalar_lea.vmem %s835_s10, 1024  ;;  %p662_p1 = scmp.lt.s32.totalorder %s835_s10, %s835_s10 }
  0x14   :  { %599 = vmatprep.subr.bf16.mxu0 %v646_v7  ;;  %626 = vmatprep.subr.bf16.mxu1 %v646_v7  ;;  %v412_v17 = vld [vmem:[%s874_s2 + $0x10] sm:$0xff]  ;;  %v410_v21 = vld [vmem:[%s874_s2] sm:$0xff]  ;;  %v413_v25 = vld [vmem:[%s874_s2 + $0x18] sm:$0xff]  ;;  %p658_p0 = scmp.ne.s32.totalorder %s835_s10, %s657_s28  ;;  %p663_p2 = scmp.lt.s32.totalorder %s657_s28, %s657_s28 }
  0x15   :  { %v420_v19 = vld [vmem:[%s874_s2 + $0x50] sm:$0xff]  ;;  %v418_v23 = vld [vmem:[%s874_s2 + $0x40] sm:$0xff]  ;;  %v421_v27 = vld [vmem:[%s874_s2 + $0x58] sm:$0xff] }
  0x16   :  { %v411_v31 = vld [vmem:[%s874_s2 + $0x8] sm:$0xff]  ;;  %v416_v45 = vld [vmem:[%s874_s2 + $0x30] sm:$0xff]  ;;  %v414_v49 = vld [vmem:[%s874_s2 + $0x20] sm:$0xff]  ;;  %p664_p3 = por %p663_p2, %p662_p1 }
  0x17   :  { %600 = vmatpush3.bf16.msra.mxu0 %v646_v7  ;;  %634 = vmatpush3.bf16.msra.mxu1 %v646_v7  ;;  %v419_v33 = vld [vmem:[%s874_s2 + $0x48] sm:$0xff]  ;;  %v424_v47 = vld [vmem:[%s874_s2 + $0x70] sm:$0xff]  ;;  %v422_v51 = vld [vmem:[%s874_s2 + $0x60] sm:$0xff] }
  0x18   :  { %601 = vmatprep.subr.bf16.mxu0 %v647_v8  ;;  %627 = vmatprep.subr.bf16.mxu1 %v647_v8  ;;  %v417_v53 = vld [vmem:[%s874_s2 + $0x38] sm:$0xff]  ;;  %v415_v59 = vld [vmem:[%s874_s2 + $0x28] sm:$0xff]  ;;  %p665_p4 = pnand %p664_p3, %p658_p0 }
  0x19   :  { %v425_v55 = vld [vmem:[%s874_s2 + $0x78] sm:$0xff]  ;;  %v423_v61 = vld [vmem:[%s874_s2 + $0x68] sm:$0xff] }
  0x1b   :  { %602 = vmatpush3.bf16.msra.mxu0 %v647_v8  ;;  %635 = vmatpush3.bf16.msra.mxu1 %v647_v8 }
  0x1c   :  { %603 = vmatprep.subr.bf16.mxu0 %v648_v9  ;;  %628 = vmatprep.subr.bf16.mxu1 %v648_v9 }
  0x1f   :  { %604 = vmatpush3.bf16.msra.mxu0 %v648_v9  ;;  %636 = vmatpush3.bf16.msra.mxu1 %v648_v9 }
  0x22   :  { %606 = vmatmul.mubr.bf16.vlgmr.msra.gmra.mrb[0].mxu0 %v651_v10  ;;  %614 = vmatmul.mubr.bf16.vlgmr.msra.gmra.mrb[0].mxu1 %v652_v11 }
  0x23   :  { %609 = vmatprep.mubr.bf16.mxu0 %v653_v12  ;;  %617 = vmatprep.mubr.bf16.mxu1 %v654_v13 }
  0x2a   :  { %610 = vmatmul.mubr.bf16.gmra.mrb[4].mxu0 %v655_v14  ;;  %618 = vmatmul.mubr.bf16.gmra.mrb[4].mxu1 %v656_v15 }
  0xf5   :  { %v607_v16 = vpop.f32.mrb[0].mxu0  ;;  %v615_v18 = vpop.f32.mrb[0].mxu1 }
  0xf6   :  { %v216_v20 = vpop.f32.mrb[1].mxu0  ;;  %v248_v22 = vpop.f32.mrb[1].mxu1  ;;  %v428_v28 = vadd.f32 %v607_v16, %v412_v17  ;;  %v436_v29 = vadd.f32 %v615_v18, %v420_v19 }
  0xf7   :  { %v608_v24 = vpop.f32.mrb[2].mxu0  ;;  %v616_v26 = vpop.f32.mrb[2].mxu1  ;;  %v426_v34 = vadd.f32 %v410_v21, %v216_v20  ;;  %v434_v35 = vadd.f32 %v418_v23, %v248_v22 }
  0xf8   :  { %v219_v30 = vpop.f32.mrb[3].mxu0  ;;  %v251_v32 = vpop.f32.mrb[3].mxu1  ;;  %444 = vst [vmem:[%s876_s4 + $0x10] sm:$0xff] %v428_v28  ;;  %452 = vst [vmem:[%s876_s4 + $0x50] sm:$0xff] %v436_v29  ;;  %v534_v36 = vpack.c.bf16 %v608_v24, %v607_v16  ;;  %v429_v37 = vadd.f32 %v608_v24, %v413_v25  ;;  %v554_v38 = vpack.c.bf16 %v616_v26, %v615_v18 }
  0xf9   :  { %v437_v39 = vadd.f32 %v616_v26, %v421_v27  ;;  %442 = vst [vmem:[%s876_s4] sm:$0xff] %v426_v34  ;;  %450 = vst [vmem:[%s876_s4 + $0x40] sm:$0xff] %v434_v35  ;;  %v529_v40 = vpack.c.bf16 %v219_v30, %v216_v20  ;;  %v427_v41 = vadd.f32 %v411_v31, %v219_v30 }
  0xfa   :  { %v549_v42 = vpack.c.bf16 %v251_v32, %v248_v22  ;;  %v435_v43 = vadd.f32 %v419_v33, %v251_v32  ;;  %566 = vst [vmem:[#allocation2 + $0x8] sm:$0xff] %v534_v36   ;;  %445 = vst [vmem:[%s876_s4 + $0x18] sm:$0xff] %v429_v37 }
  0xfb   :  { %570 = vst [vmem:[#allocation2 + $0x28] sm:$0xff] %v554_v38   ;;  %453 = vst [vmem:[%s876_s4 + $0x58] sm:$0xff] %v437_v39 }
  0xfc   :  { %530 = vst [vmem:[#allocation2] sm:$0xff] %v529_v40   ;;  %443 = vst [vmem:[%s876_s4 + $0x8] sm:$0xff] %v427_v41 }
  0xfd   :  { %569 = vst [vmem:[#allocation2 + $0x20] sm:$0xff] %v549_v42   ;;  %451 = vst [vmem:[%s876_s4 + $0x48] sm:$0xff] %v435_v43  ;;  %v611_v44 = vpop.f32.mrb[4].mxu0  ;;  %v619_v46 = vpop.f32.mrb[4].mxu1 }
  0xfe   :  { %v232_v48 = vpop.f32.mrb[5].mxu0  ;;  %v264_v50 = vpop.f32.mrb[5].mxu1  ;;  %v432_v56 = vadd.f32 %v611_v44, %v416_v45  ;;  %v440_v57 = vadd.f32 %v619_v46, %v424_v47 }
  0xff   :  { %v612_v52 = vpop.f32.mrb[6].mxu0  ;;  %v620_v54 = vpop.f32.mrb[6].mxu1  ;;  %v430_v62 = vadd.f32 %v414_v49, %v232_v48  ;;  %v438_v63 = vadd.f32 %v422_v51, %v264_v50 }
 0x100   :  { %v235_v58 = vpop.f32.mrb[7].mxu0  ;;  %v267_v60 = vpop.f32.mrb[7].mxu1  ;;  %448 = vst [vmem:[%s876_s4 + $0x30] sm:$0xff] %v432_v56  ;;  %456 = vst [vmem:[%s876_s4 + $0x70] sm:$0xff] %v440_v57  ;;  %v544_v0 = vpack.c.bf16 %v612_v52, %v611_v44  ;;  %v433_v1 = vadd.f32 %v612_v52, %v417_v53  ;;  %v564_v2 = vpack.c.bf16 %v620_v54, %v619_v46 }
 0x101   :  { %v441_v3 = vadd.f32 %v620_v54, %v425_v55  ;;  %446 = vst [vmem:[%s876_s4 + $0x20] sm:$0xff] %v430_v62  ;;  %454 = vst [vmem:[%s876_s4 + $0x60] sm:$0xff] %v438_v63  ;;  %v539_v4 = vpack.c.bf16 %v235_v58, %v232_v48  ;;  %v431_v5 = vadd.f32 %v415_v59, %v235_v58 }
 0x102   :  { %v559_v6 = vpack.c.bf16 %v267_v60, %v264_v50  ;;  %v439_v7 = vadd.f32 %v423_v61, %v267_v60  ;;  %568 = vst [vmem:[#allocation2 + $0x18] sm:$0xff] %v544_v0   ;;  %449 = vst [vmem:[%s876_s4 + $0x38] sm:$0xff] %v433_v1 }
 0x103   :  { %572 = vst [vmem:[#allocation2 + $0x38] sm:$0xff] %v564_v2   ;;  %457 = vst [vmem:[%s876_s4 + $0x78] sm:$0xff] %v441_v3 }
 0x104   :  { %567 = vst [vmem:[#allocation2 + $0x10] sm:$0xff] %v539_v4   ;;  %447 = vst [vmem:[%s876_s4 + $0x28] sm:$0xff] %v431_v5 }
 0x105   :  { %571 = vst [vmem:[#allocation2 + $0x30] sm:$0xff] %v559_v6   ;;  %455 = vst [vmem:[%s876_s4 + $0x68] sm:$0xff] %v439_v7 }
 0x106   :  { %668 = shalt.err (!%p665_p4)
}
 0x107   :  { %s669_s5 = scalar_lea.hbm %s875_s3, 1024 }
 0x108   :  { %p670_p5 = scmp.ne.s32.totalorder %s875_s3, %s669_s5  ;;  %p673_p6 = scmp.lt.u32.totalorder %s669_s5, %s875_s3 }
 0x10a   :  { %p675_p7 = pnand %p673_p6, %p670_p5 }
 0x10c   :  { %678 = shalt.err (!%p675_p7)
}
 0x10d   :  { %s682_s4 = smov 64   ;;  %s683_s11 = smov 4  }
 0x10e   :  { %469 = dma.vmem_to_hbm [thread:$0]  %s835_s10, 1024, %s875_s3, [#allocation3], %s682_s4, %s682_s4, %s683_s11  }
 0x10f   :  { %679 = dma.done.wait [#allocation3], 1024  }
 0x110   :  { %680 = vsyncadd [#allocation3], 4294966272 }
 0x111   :  { %477 = vsyncpa [#allocation3], 1 }

// kernel: consrec_forward.7
= control target key start
LH: loop header
LB: loop body
LE: loop exit
PB: predicated region body
PF: predicated region fallthrough
CT: control target
= control target key end

     0   :  { %s517_s1 = inlined_call_operand.vmem [shape: bf16[128,128], index: 1, kind: input, shape index: {}]   ;;  %s518_s0 = inlined_call_operand.vmem [shape: bf16[128,128], index: 0, kind: input, shape index: {}]   ;;  %s519_s2 = inlined_call_operand.vmem [shape: f32[128,128], index: 2, kind: output, shape index: {}]  }
   0x1   :  { %v390_v0 = vld [vmem:[%s517_s1] sm:$0xff]   ;;  %v391_v1 = vld [vmem:[%s517_s1 + $0x8] sm:$0xff]   ;;  %v392_v2 = vld [vmem:[%s517_s1 + $0x10] sm:$0xff]  }
   0x2   :  { %341 = vmatprep.subr.bf16.mxu0 %v390_v0  ;;  %373 = vmatprep.subr.bf16.mxu1 %v390_v0  ;;  %v393_v3 = vld [vmem:[%s517_s1 + $0x18] sm:$0xff]   ;;  %v398_v4 = vld [vmem:[%s518_s0] sm:$0xff]   ;;  %v395_v7 = vld [vmem:[%s517_s1 + $0x28] sm:$0xff]  }
   0x3   :  { %342 = vmatpush3.bf16.msra.mxu0 %v390_v0  ;;  %381 = vmatpush3.bf16.msra.mxu1 %v390_v0  ;;  %v399_v5 = vld [vmem:[%s518_s0 + $0x20] sm:$0xff]   ;;  %v396_v8 = vld [vmem:[%s517_s1 + $0x30] sm:$0xff]   ;;  %v397_v9 = vld [vmem:[%s517_s1 + $0x38] sm:$0xff]  }
   0x4   :  { %343 = vmatprep.subr.bf16.mxu0 %v391_v1  ;;  %374 = vmatprep.subr.bf16.mxu1 %v391_v1  ;;  %v394_v6 = vld [vmem:[%s517_s1 + $0x20] sm:$0xff]   ;;  %v400_v10 = vld [vmem:[%s518_s0 + $0x8] sm:$0xff]   ;;  %v402_v12 = vld [vmem:[%s518_s0 + $0x10] sm:$0xff]  }
   0x5   :  { %357 = vmatprep.mubr.bf16.mxu0 %v398_v4  ;;  %365 = vmatprep.mubr.bf16.mxu1 %v399_v5  ;;  %v401_v11 = vld [vmem:[%s518_s0 + $0x28] sm:$0xff]   ;;  %v403_v13 = vld [vmem:[%s518_s0 + $0x30] sm:$0xff]   ;;  %v404_v14 = vld [vmem:[%s518_s0 + $0x18] sm:$0xff]  }
   0x6   :  { %v405_v15 = vld [vmem:[%s518_s0 + $0x38] sm:$0xff]  }
   0x7   :  { %344 = vmatpush3.bf16.msra.mxu0 %v391_v1  ;;  %382 = vmatpush3.bf16.msra.mxu1 %v391_v1 }
   0x8   :  { %345 = vmatprep.subr.bf16.mxu0 %v392_v2  ;;  %375 = vmatprep.subr.bf16.mxu1 %v392_v2 }
   0xb   :  { %346 = vmatpush3.bf16.msra.mxu0 %v392_v2  ;;  %383 = vmatpush3.bf16.msra.mxu1 %v392_v2 }
   0xc   :  { %347 = vmatprep.subr.bf16.mxu0 %v393_v3  ;;  %376 = vmatprep.subr.bf16.mxu1 %v393_v3 }
   0xf   :  { %348 = vmatpush3.bf16.msra.mxu0 %v393_v3  ;;  %384 = vmatpush3.bf16.msra.mxu1 %v393_v3 }
  0x10   :  { %349 = vmatprep.subr.bf16.mxu0 %v394_v6  ;;  %377 = vmatprep.subr.bf16.mxu1 %v394_v6 }
  0x13   :  { %350 = vmatpush3.bf16.msra.mxu0 %v394_v6  ;;  %385 = vmatpush3.bf16.msra.mxu1 %v394_v6 }
  0x14   :  { %351 = vmatprep.subr.bf16.mxu0 %v395_v7  ;;  %378 = vmatprep.subr.bf16.mxu1 %v395_v7 }
  0x17   :  { %352 = vmatpush3.bf16.msra.mxu0 %v395_v7  ;;  %386 = vmatpush3.bf16.msra.mxu1 %v395_v7 }
  0x18   :  { %353 = vmatprep.subr.bf16.mxu0 %v396_v8  ;;  %379 = vmatprep.subr.bf16.mxu1 %v396_v8 }
  0x1b   :  { %354 = vmatpush3.bf16.msra.mxu0 %v396_v8  ;;  %387 = vmatpush3.bf16.msra.mxu1 %v396_v8 }
  0x1c   :  { %355 = vmatprep.subr.bf16.mxu0 %v397_v9  ;;  %380 = vmatprep.subr.bf16.mxu1 %v397_v9 }
  0x1f   :  { %356 = vmatpush3.bf16.msra.mxu0 %v397_v9  ;;  %388 = vmatpush3.bf16.msra.mxu1 %v397_v9 }
  0x22   :  { %358 = vmatmul.mubr.bf16.vlgmr.msra.gmra.mrb[0].mxu0 %v400_v10  ;;  %366 = vmatmul.mubr.bf16.vlgmr.msra.gmra.mrb[0].mxu1 %v401_v11 }
  0x23   :  { %361 = vmatprep.mubr.bf16.mxu0 %v402_v12  ;;  %369 = vmatprep.mubr.bf16.mxu1 %v403_v13 }
  0x2a   :  { %362 = vmatmul.mubr.bf16.gmra.mrb[4].mxu0 %v404_v14  ;;  %370 = vmatmul.mubr.bf16.gmra.mrb[4].mxu1 %v405_v15 }
  0xf5   :  { %v359_v16 = vpop.f32.mrb[0].mxu0  ;;  %v367_v17 = vpop.f32.mrb[0].mxu1 }
  0xf6   :  { %v210_v18 = vpop.f32.mrb[1].mxu0  ;;  %v242_v19 = vpop.f32.mrb[1].mxu1  ;;  %291 = vst [vmem:[%s519_s2 + $0x10] sm:$0xff] %v359_v16  ;;  %299 = vst [vmem:[%s519_s2 + $0x50] sm:$0xff] %v367_v17 }
  0xf7   :  { %v360_v20 = vpop.f32.mrb[2].mxu0  ;;  %v368_v21 = vpop.f32.mrb[2].mxu1  ;;  %289 = vst [vmem:[%s519_s2] sm:$0xff] %v210_v18  ;;  %297 = vst [vmem:[%s519_s2 + $0x40] sm:$0xff] %v242_v19 }
  0xf8   :  { %v213_v22 = vpop.f32.mrb[3].mxu0  ;;  %v245_v23 = vpop.f32.mrb[3].mxu1  ;;  %292 = vst [vmem:[%s519_s2 + $0x18] sm:$0xff] %v360_v20  ;;  %300 = vst [vmem:[%s519_s2 + $0x58] sm:$0xff] %v368_v21 }
  0xf9   :  { %290 = vst [vmem:[%s519_s2 + $0x8] sm:$0xff] %v213_v22  ;;  %298 = vst [vmem:[%s519_s2 + $0x48] sm:$0xff] %v245_v23 }
  0xfd   :  { %v363_v24 = vpop.f32.mrb[4].mxu0  ;;  %v371_v25 = vpop.f32.mrb[4].mxu1 }
  0xfe   :  { %v226_v26 = vpop.f32.mrb[5].mxu0  ;;  %v258_v27 = vpop.f32.mrb[5].mxu1  ;;  %295 = vst [vmem:[%s519_s2 + $0x30] sm:$0xff] %v363_v24  ;;  %303 = vst [vmem:[%s519_s2 + $0x70] sm:$0xff] %v371_v25 }
  0xff   :  { %v364_v28 = vpop.f32.mrb[6].mxu0  ;;  %v372_v29 = vpop.f32.mrb[6].mxu1  ;;  %293 = vst [vmem:[%s519_s2 + $0x20] sm:$0xff] %v226_v26  ;;  %301 = vst [vmem:[%s519_s2 + $0x60] sm:$0xff] %v258_v27 }
 0x100   :  { %v229_v30 = vpop.f32.mrb[7].mxu0  ;;  %v261_v31 = vpop.f32.mrb[7].mxu1  ;;  %296 = vst [vmem:[%s519_s2 + $0x38] sm:$0xff] %v364_v28  ;;  %304 = vst [vmem:[%s519_s2 + $0x78] sm:$0xff] %v372_v29 }
 0x101   :  { %294 = vst [vmem:[%s519_s2 + $0x28] sm:$0xff] %v229_v30  ;;  %302 = vst [vmem:[%s519_s2 + $0x68] sm:$0xff] %v261_v31 }

// kernel: consrec_forward.9
= control target key start
LH: loop header
LB: loop body
LE: loop exit
PB: predicated region body
PF: predicated region fallthrough
CT: control target
= control target key end

     0   :  { %10 = vsyncpa [#allocation3], 0  ;;  %s1539_s0 = inlined_call_operand.vmem [shape: f32[128,128], index: 0, kind: input, shape index: {}]   ;;  %s1540_s1 = inlined_call_operand.vmem [shape: f32[128,128], index: 1, kind: input, shape index: {}]   ;;  %s1541_s2 = inlined_call_operand.vmem [shape: f32[128,128], index: 2, kind: input, shape index: {}]   ;;  %s1542_s3 = inlined_call_operand.vmem [shape: f32[8,128], index: 3, kind: input, shape index: {}]   ;;  %s1543_s4 = inlined_call_operand.vmem [shape: f32[3], index: 4, kind: input, shape index: {}]   ;;  %s1544_s5 = inlined_call_operand.vmem [shape: f32[128,128], index: 5, kind: output, shape index: {}]  }
   0x1   :  { %s25_s20 = sshll.u32 %s1543_s4, 4  ;;  %s26_s20 = int_to_ptr.vmem [resolvable:$true] %s25_s20 }
   0x2   :  { %s936_s21 = scalar_lea.vmem %s26_s20, 16  ;;  %p941_p1 = scmp.lt.s32.totalorder %s26_s20, %s26_s20 }
   0x3   :  { %p937_p0 = scmp.ne.s32.totalorder %s26_s20, %s936_s21  ;;  %p942_p2 = scmp.lt.s32.totalorder %s936_s21, %s936_s21 }
   0x5   :  { %p943_p3 = por %p942_p2, %p941_p1 }
   0x7   :  { %p944_p4 = pnand %p943_p3, %p937_p0 }
   0x9   :  { %947 = shalt.err (!%p944_p4)
}
   0xa   :  { %s950_s22 = smov [#allocation2]  }
   0xb   :  { %28 = dma.vmem_to_smem %s26_s20, 16, %s950_s22, [#allocation3]  }
   0xc   :  { %948 = dma.done.wait [#allocation3], 16  }
   0xd   :  { %949 = vsyncadd [#allocation3], 4294967280 }
   0xe   :  { %32 = sfence }
   0xf   :  { %v82_v0 = vlaneseq  ;;  %v81_v2 = vld [vmem:[%s1542_s3] sm:$0xff]  ;;  %v990_v5 = vld [vmem:[%s1539_s0 + $0x10] sm:$0xff]  ;;  %v1002_v9 = vld [vmem:[%s1539_s0 + $0x18] sm:$0xff]  ;;  %s134_s13 = sld [smem:[#allocation2]]  ;;  %s1311_s14 = sld [smem:[#allocation2 + $0x2]] }
  0x10   :  { %v995_v6 = vld [vmem:[%s1539_s0] sm:$0xff]  ;;  %v1007_v10 = vld [vmem:[%s1539_s0 + $0x8] sm:$0xff]  ;;  %v1028_v19 = vld [vmem:[%s1539_s0 + $0x38] sm:$0xff] }
  0x11   :  { %v83_v1 = vshrl.u32 %v82_v0, 7  ;;  %v1016_v15 = vld [vmem:[%s1539_s0 + $0x28] sm:$0xff]  ;;  %v1021_v16 = vld [vmem:[%s1539_s0 + $0x20] sm:$0xff]  ;;  %v39_v20 = vld [vmem:[%s1539_s0 + $0x30] sm:$0xff] }
  0x12   :  { %v42_v23 = vld [vmem:[%s1539_s0 + $0x48] sm:$0xff]  ;;  %v41_v24 = vld [vmem:[%s1539_s0 + $0x40] sm:$0xff]  ;;  %v44_v27 = vld [vmem:[%s1539_s0 + $0x58] sm:$0xff] }
  0x13   :  { %v84_v3 = vsub.s32 0, %v83_v1  ;;  %v464_v4 = vsub.s32 2, %v83_v1  ;;  %v43_v28 = vld [vmem:[%s1539_s0 + $0x50] sm:$0xff]  ;;  %v46_v31 = vld [vmem:[%s1539_s0 + $0x68] sm:$0xff]  ;;  %v45_v32 = vld [vmem:[%s1539_s0 + $0x60] sm:$0xff]  ;;  %v266_v35 = vsub.s32 1, %v83_v1 }
  0x14   :  { %v48_v36 = vld [vmem:[%s1539_s0 + $0x78] sm:$0xff]  ;;  %v47_v37 = vld [vmem:[%s1539_s0 + $0x70] sm:$0xff]  ;;  %v1061_v41 = vld [vmem:[%s1540_s1 + $0x8] sm:$0xff] }
  0x15   :  { %v85_v7 = vrot.slane %v81_v2, %v84_v3  ;;  %v997_v8 = vrot.slane %v81_v2, %v464_v4  ;;  %v267_v40 = vrot.slane %v81_v2, %v266_v35  ;;  %v1066_v42 = vld [vmem:[%s1540_s1] sm:$0xff]  ;;  %v1073_v45 = vld [vmem:[%s1540_s1 + $0x18] sm:$0xff]  ;;  %v1078_v46 = vld [vmem:[%s1540_s1 + $0x10] sm:$0xff] }
  0x16   :  { %v1085_v49 = vld [vmem:[%s1540_s1 + $0x28] sm:$0xff]  ;;  %v1090_v50 = vld [vmem:[%s1540_s1 + $0x20] sm:$0xff]  ;;  %v1097_v53 = vld [vmem:[%s1540_s1 + $0x38] sm:$0xff] }
  0x17   :  { %v88_v11 = vmul.f32 %v85_v7, %v990_v5  ;;  %v86_v12 = vmul.f32 %v85_v7, %v995_v6  ;;  %v89_v13 = vmul.f32 %v85_v7, %v1002_v9  ;;  %v87_v14 = vmul.f32 %v85_v7, %v1007_v10  ;;  %v1102_v54 = vld [vmem:[%s1540_s1 + $0x30] sm:$0xff]  ;;  %v1109_v57 = vld [vmem:[%s1540_s1 + $0x48] sm:$0xff]  ;;  %v1114_v58 = vld [vmem:[%s1540_s1 + $0x40] sm:$0xff] }
  0x18   :  { %v91_v17 = vmul.f32 %v85_v7, %v1016_v15  ;;  %v90_v18 = vmul.f32 %v85_v7, %v1021_v16  ;;  %v93_v21 = vmul.f32 %v85_v7, %v1028_v19  ;;  %v92_v22 = vmul.f32 %v85_v7, %v39_v20  ;;  %v1121_v61 = vld [vmem:[%s1540_s1 + $0x58] sm:$0xff]  ;;  %v1126_v62 = vld [vmem:[%s1540_s1 + $0x50] sm:$0xff]  ;;  %v1133_v1 = vld [vmem:[%s1540_s1 + $0x68] sm:$0xff] }
  0x19   :  { %106 = vadd.xlane.f32.xlu1 %v88_v11  ;;  %102 = vadd.xlane.f32.xlu0 %v86_v12  ;;  %v95_v25 = vmul.f32 %v85_v7, %v42_v23  ;;  %v94_v26 = vmul.f32 %v85_v7, %v41_v24  ;;  %v97_v29 = vmul.f32 %v85_v7, %v44_v27  ;;  %v61_v2 = vld [vmem:[%s1540_s1 + $0x60] sm:$0xff]  ;;  %v63_v11 = vld [vmem:[%s1540_s1 + $0x70] sm:$0xff] }
  0x1a   :  { %v96_v30 = vmul.f32 %v85_v7, %v43_v28  ;;  %v99_v33 = vmul.f32 %v85_v7, %v46_v31  ;;  %v98_v34 = vmul.f32 %v85_v7, %v45_v32  ;;  %v101_v38 = vmul.f32 %v85_v7, %v48_v36  ;;  %1556 = vst [vmem:[#allocation5_spill] sm:$0xff] %v1121_v61 }
  0x1b   :  { %v100_v39 = vmul.f32 %v85_v7, %v47_v37  ;;  %v269_v43 = vmul.f32 %v267_v40, %v1061_v41  ;;  %v268_v44 = vmul.f32 %v267_v40, %v1066_v42  ;;  %v271_v47 = vmul.f32 %v267_v40, %v1073_v45  ;;  %1557 = vst [vmem:[#allocation6_spill] sm:$0xff] %v1126_v62  ;;  %v64_v7 = vld [vmem:[%s1540_s1 + $0x78] sm:$0xff] }
  0x1c   :  { %v270_v48 = vmul.f32 %v267_v40, %v1078_v46  ;;  %v273_v51 = vmul.f32 %v267_v40, %v1085_v49  ;;  %v272_v52 = vmul.f32 %v267_v40, %v1090_v50  ;;  %v275_v55 = vmul.f32 %v267_v40, %v1097_v53  ;;  %1558 = vst [vmem:[#allocation7_spill] sm:$0xff] %v1133_v1  ;;  %v1218_v37 = vld [vmem:[%s1541_s2 + $0x58] sm:$0xff] }
  0x1d   :  { %108 = vadd.xlane.f32.xlu1 %v89_v13  ;;  %104 = vadd.xlane.f32.xlu0 %v87_v14  ;;  %v274_v56 = vmul.f32 %v267_v40, %v1102_v54  ;;  %v277_v59 = vmul.f32 %v267_v40, %v1109_v57  ;;  %v276_v60 = vmul.f32 %v267_v40, %v1114_v58  ;;  %v1148_v14 = vld [vmem:[%s1541_s2 + $0x8] sm:$0xff] }
  0x1e   :  { %v279_v63 = vmul.f32 %v267_v40, %v1121_v61  ;;  %v278_v0 = vmul.f32 %v267_v40, %v1126_v62  ;;  %v281_v3 = vmul.f32 %v267_v40, %v1133_v1  ;;  %v280_v4 = vmul.f32 %v267_v40, %v61_v2  ;;  %1561 = vst [vmem:[#allocation10_spill] sm:$0xff] %v1218_v37 }
  0x1f   :  { %v283_v12 = vmul.f32 %v267_v40, %v64_v7  ;;  %v282_v13 = vmul.f32 %v267_v40, %v63_v11 }
  0x21   :  { %112 = vadd.xlane.f32.xlu1 %v91_v17  ;;  %110 = vadd.xlane.f32.xlu0 %v90_v18  ;;  %v1153_v17 = vld [vmem:[%s1541_s2] sm:$0xff]  ;;  %v467_v18 = vmul.f32 %v997_v8, %v1148_v14 }
  0x22   :  { %v466_v20 = vmul.f32 %v997_v8, %v1153_v17 }
  0x25   :  { %116 = vadd.xlane.f32.xlu1 %v93_v21  ;;  %114 = vadd.xlane.f32.xlu0 %v92_v22  ;;  %v1162_v21 = vld [vmem:[%s1541_s2 + $0x18] sm:$0xff]  ;;  %v1167_v22 = vld [vmem:[%s1541_s2 + $0x10] sm:$0xff] }
  0x26   :  { %v469_v23 = vmul.f32 %v997_v8, %v1162_v21  ;;  %v468_v24 = vmul.f32 %v997_v8, %v1167_v22 }
  0x29   :  { %120 = vadd.xlane.f32.xlu1 %v95_v25  ;;  %118 = vadd.xlane.f32.xlu0 %v94_v26  ;;  %v1176_v25 = vld [vmem:[%s1541_s2 + $0x28] sm:$0xff]  ;;  %v1181_v26 = vld [vmem:[%s1541_s2 + $0x20] sm:$0xff] }
  0x2a   :  { %v471_v27 = vmul.f32 %v997_v8, %v1176_v25  ;;  %v470_v28 = vmul.f32 %v997_v8, %v1181_v26 }
  0x2d   :  { %124 = vadd.xlane.f32.xlu1 %v97_v29  ;;  %122 = vadd.xlane.f32.xlu0 %v96_v30  ;;  %v1190_v29 = vld [vmem:[%s1541_s2 + $0x38] sm:$0xff]  ;;  %v1195_v30 = vld [vmem:[%s1541_s2 + $0x30] sm:$0xff] }
  0x2e   :  { %v473_v31 = vmul.f32 %v997_v8, %v1190_v29  ;;  %v472_v32 = vmul.f32 %v997_v8, %v1195_v30 }
  0x31   :  { %128 = vadd.xlane.f32.xlu1 %v99_v33  ;;  %126 = vadd.xlane.f32.xlu0 %v98_v34  ;;  %v1204_v33 = vld [vmem:[%s1541_s2 + $0x48] sm:$0xff]  ;;  %v1209_v34 = vld [vmem:[%s1541_s2 + $0x40] sm:$0xff] }
  0x32   :  { %1559 = vst [vmem:[#allocation8_spill] sm:$0xff] %v1204_v33  ;;  %1560 = vst [vmem:[#allocation9_spill] sm:$0xff] %v1209_v34  ;;  %v475_v35 = vmul.f32 %v997_v8, %v1204_v33  ;;  %v474_v36 = vmul.f32 %v997_v8, %v1209_v34 }
  0x35   :  { %132 = vadd.xlane.f32.xlu1 %v101_v38  ;;  %130 = vadd.xlane.f32.xlu0 %v100_v39  ;;  %v1223_v38 = vld [vmem:[%s1541_s2 + $0x50] sm:$0xff]  ;;  %v477_v39 = vmul.f32 %v997_v8, %v1218_v37 }
  0x36   :  { %1562 = vst [vmem:[#allocation11_spill] sm:$0xff] %v1223_v38  ;;  %v476_v40 = vmul.f32 %v997_v8, %v1223_v38 }
  0x39   :  { %286 = vadd.xlane.f32.xlu1 %v269_v43  ;;  %284 = vadd.xlane.f32.xlu0 %v268_v44  ;;  %v1232_v43 = vld [vmem:[%s1541_s2 + $0x68] sm:$0xff]  ;;  %v1237_v44 = vld [vmem:[%s1541_s2 + $0x60] sm:$0xff] }
  0x3a   :  { %1563 = vst [vmem:[#allocation12_spill] sm:$0xff] %v1232_v43  ;;  %1564 = vst [vmem:[#allocation13_spill] sm:$0xff] %v1237_v44 }
  0x3d   :  { %290 = vadd.xlane.f32.xlu1 %v271_v47  ;;  %288 = vadd.xlane.f32.xlu0 %v270_v48  ;;  %v479_v47 = vmul.f32 %v997_v8, %v1232_v43  ;;  %v478_v48 = vmul.f32 %v997_v8, %v1237_v44 }
  0x41   :  { %294 = vadd.xlane.f32.xlu1 %v273_v51  ;;  %292 = vadd.xlane.f32.xlu0 %v272_v52  ;;  %v1246_v51 = vld [vmem:[%s1541_s2 + $0x78] sm:$0xff]  ;;  %v1251_v52 = vld [vmem:[%s1541_s2 + $0x70] sm:$0xff]  ;;  %s697_s2 = sld [smem:[#allocation2 + $0x1]] }
  0x42   :  { %1565 = vst [vmem:[#allocation14_spill] sm:$0xff] %v1246_v51  ;;  %1566 = vst [vmem:[#allocation15_spill] sm:$0xff] %v1251_v52 }
  0x45   :  { %298 = vadd.xlane.f32.xlu1 %v275_v55  ;;  %296 = vadd.xlane.f32.xlu0 %v274_v56  ;;  %v481_v55 = vmul.f32 %v997_v8, %v1246_v51  ;;  %v480_v56 = vmul.f32 %v997_v8, %v1251_v52 }
  0x49   :  { %302 = vadd.xlane.f32.xlu1 %v277_v59  ;;  %300 = vadd.xlane.f32.xlu0 %v276_v60  ;;  %v1257_v59 = vstv %s134_s13 }
  0x4d   :  { %306 = vadd.xlane.f32.xlu1 %v279_v63  ;;  %304 = vadd.xlane.f32.xlu0 %v278_v0 }
  0x51   :  { %310 = vadd.xlane.f32.xlu1 %v281_v3  ;;  %308 = vadd.xlane.f32.xlu0 %v280_v4 }
  0x55   :  { %314 = vadd.xlane.f32.xlu1 %v283_v12  ;;  %312 = vadd.xlane.f32.xlu0 %v282_v13 }
  0x59   :  { %484 = vadd.xlane.f32.xlu1 %v467_v18  ;;  %482 = vadd.xlane.f32.xlu0 %v466_v20 }
  0x5d   :  { %488 = vadd.xlane.f32.xlu1 %v469_v23  ;;  %486 = vadd.xlane.f32.xlu0 %v468_v24 }
  0x61   :  { %492 = vadd.xlane.f32.xlu1 %v471_v27  ;;  %490 = vadd.xlane.f32.xlu0 %v470_v28 }
  0x65   :  { %496 = vadd.xlane.f32.xlu1 %v473_v31  ;;  %494 = vadd.xlane.f32.xlu0 %v472_v32 }
  0x69   :  { %500 = vadd.xlane.f32.xlu1 %v475_v35  ;;  %498 = vadd.xlane.f32.xlu0 %v474_v36 }
  0x6d   :  { %504 = vadd.xlane.f32.xlu1 %v477_v39  ;;  %502 = vadd.xlane.f32.xlu0 %v476_v40 }
  0x71   :  { %508 = vadd.xlane.f32.xlu1 %v479_v47  ;;  %506 = vadd.xlane.f32.xlu0 %v478_v48 }
  0x75   :  { %512 = vadd.xlane.f32.xlu1 %v481_v55  ;;  %510 = vadd.xlane.f32.xlu0 %v480_v56 }
  0xa6   :  { %v107_v60 = vpop.xlane.xlu1 %106  ;;  %v103_v63 = vpop.xlane.xlu0 %102 }
  0xa7   :  { %v138_v0 = vadd.f32 %v1257_v59, %v107_v60  ;;  %v136_v2 = vadd.f32 %v1257_v59, %v103_v63 }
  0xa9   :  { %v683_v3 = vmul.f32 -1.442695, %v138_v0  ;;  %v681_v11 = vmul.f32 -1.442695, %v136_v2 }
  0xaa   :  { %v109_v4 = vpop.xlane.xlu1 %108  ;;  %v105_v7 = vpop.xlane.xlu0 %104 }
  0xab   :  { %v139_v12 = vadd.f32 %v1257_v59, %v109_v4  ;;  %v137_v13 = vadd.f32 %v1257_v59, %v105_v7  ;;  %732 = vpow2.f32 %v683_v3 }
  0xac   :  { %734 = vpow2.f32 %v681_v11 }
  0xad   :  { %v684_v8 = vmul.f32 -1.442695, %v139_v12  ;;  %v682_v18 = vmul.f32 -1.442695, %v137_v13 }
  0xae   :  { %v113_v20 = vpop.xlane.xlu1 %112  ;;  %v111_v23 = vpop.xlane.xlu0 %110 }
  0xaf   :  { %v141_v24 = vadd.f32 %v1257_v59, %v113_v20  ;;  %v140_v27 = vadd.f32 %v1257_v59, %v111_v23  ;;  %736 = vpow2.f32 %v684_v8 }
  0xb0   :  { %738 = vpow2.f32 %v682_v18 }
  0xb1   :  { %v686_v28 = vmul.f32 -1.442695, %v141_v24  ;;  %v685_v31 = vmul.f32 -1.442695, %v140_v27 }
  0xb2   :  { %v117_v32 = vpop.xlane.xlu1 %116  ;;  %v115_v35 = vpop.xlane.xlu0 %114 }
  0xb3   :  { %740 = vpow2.f32 %v686_v28  ;;  %v143_v36 = vadd.f32 %v1257_v59, %v117_v32  ;;  %v142_v39 = vadd.f32 %v1257_v59, %v115_v35 }
  0xb4   :  { %742 = vpow2.f32 %v685_v31 }
  0xb5   :  { %v688_v40 = vmul.f32 -1.442695, %v143_v36  ;;  %v687_v47 = vmul.f32 -1.442695, %v142_v39  ;;  %v733_v56 = vpop.eup %732 }
  0xb6   :  { %v121_v48 = vpop.xlane.xlu1 %120  ;;  %v119_v55 = vpop.xlane.xlu0 %118  ;;  %v202_v3 = vadd.f32 1.0, %v733_v56 }
  0xb7   :  { %744 = vpow2.f32 %v688_v40  ;;  %v145_v60 = vadd.f32 %v1257_v59, %v121_v48  ;;  %v144_v63 = vadd.f32 %v1257_v59, %v119_v55  ;;  %v735_v0 = vpop.eup %734 }
  0xb8   :  { %746 = vpow2.f32 %v687_v47  ;;  %v200_v18 = vadd.f32 1.0, %v735_v0 }
  0xb9   :  { %v690_v2 = vmul.f32 -1.442695, %v145_v60  ;;  %v737_v11 = vpop.eup %736  ;;  %v689_v12 = vmul.f32 -1.442695, %v144_v63 }
  0xba   :  { %v125_v4 = vpop.xlane.xlu1 %124  ;;  %v123_v7 = vpop.xlane.xlu0 %122  ;;  %v203_v27 = vadd.f32 1.0, %v737_v11 }
  0xbb   :  { %v147_v13 = vadd.f32 %v1257_v59, %v125_v4  ;;  %v739_v8 = vpop.eup %738  ;;  %748 = vpow2.f32 %v690_v2  ;;  %v146_v24 = vadd.f32 %v1257_v59, %v123_v7  ;;  %v1275_v7 = vstv %s697_s2 }
  0xbc   :  { %750 = vrcp.f32 %v202_v3  ;;  %v201_v32 = vadd.f32 1.0, %v739_v8 }
  0xbd   :  { %v741_v20 = vpop.eup %740  ;;  %v692_v23 = vmul.f32 -1.442695, %v147_v13  ;;  %752 = vpow2.f32 %v689_v12  ;;  %v691_v47 = vmul.f32 -1.442695, %v146_v24 }
  0xbe   :  { %v129_v28 = vpop.xlane.xlu1 %128  ;;  %v127_v31 = vpop.xlane.xlu0 %126  ;;  %754 = vrcp.f32 %v200_v18  ;;  %v205_v39 = vadd.f32 1.0, %v741_v20 }
  0xbf   :  { %v149_v35 = vadd.f32 %v1257_v59, %v129_v28  ;;  %v743_v36 = vpop.eup %742  ;;  %756 = vpow2.f32 %v692_v23  ;;  %v148_v48 = vadd.f32 %v1257_v59, %v127_v31 }
  0xc0   :  { %758 = vrcp.f32 %v203_v27  ;;  %v204_v63 = vadd.f32 1.0, %v743_v36 }
  0xc1   :  { %v745_v40 = vpop.eup %744  ;;  %v694_v55 = vmul.f32 -1.442695, %v149_v35  ;;  %760 = vrcp.f32 %v201_v32  ;;  %v693_v11 = vmul.f32 -1.442695, %v148_v48 }
  0xc2   :  { %v133_v56 = vpop.xlane.xlu1 %132  ;;  %v131_v60 = vpop.xlane.xlu0 %130  ;;  %762 = vrcp.f32 %v205_v39  ;;  %v207_v3 = vadd.f32 1.0, %v745_v40 }
  0xc3   :  { %v151_v0 = vadd.f32 %v1257_v59, %v133_v56  ;;  %v747_v2 = vpop.eup %746  ;;  %v150_v4 = vadd.f32 %v1257_v59, %v131_v60  ;;  %764 = vpow2.f32 %v691_v47 }
  0xc4   :  { %766 = vpow2.f32 %v694_v55  ;;  %v206_v20 = vadd.f32 1.0, %v747_v2 }
  0xc5   :  { %v696_v12 = vmul.f32 -1.442695, %v151_v0  ;;  %v749_v18 = vpop.eup %748  ;;  %768 = vrcp.f32 %v204_v63  ;;  %v695_v28 = vmul.f32 -1.442695, %v150_v4 }
  0xc6   :  { %v287_v13 = vpop.xlane.xlu1 %286  ;;  %v285_v8 = vpop.xlane.xlu0 %284  ;;  %770 = vrcp.f32 %v207_v3  ;;  %v209_v35 = vadd.f32 1.0, %v749_v18 }
  0xc7   :  { %v319_v23 = vadd.f32 %v1275_v7, %v287_v13  ;;  %v318_v24 = vadd.f32 %v1275_v7, %v285_v8  ;;  %v1279_v27 = vpop.eup %750  ;;  %772 = vpow2.f32 %v693_v11 }
  0xc8   :  { %v753_v59 = vpop.eup %752  ;;  %774 = vpow2.f32 %v696_v12 }
  0xc9   :  { %v699_v31 = vmul.f32 -1.442695, %v319_v23  ;;  %v1281_v32 = vpop.eup %754  ;;  %776 = vrcp.f32 %v206_v20  ;;  %v698_v47 = vmul.f32 -1.442695, %v318_v24  ;;  %v208_v60 = vadd.f32 1.0, %v753_v59 }
  0xca   :  { %v291_v36 = vpop.xlane.xlu1 %290  ;;  %v289_v39 = vpop.xlane.xlu0 %288  ;;  %778 = vpow2.f32 %v695_v28 }
  0xcb   :  { %v757_v40 = vpop.eup %756  ;;  %v321_v48 = vadd.f32 %v1275_v7, %v291_v36  ;;  %v320_v55 = vadd.f32 %v1275_v7, %v289_v39  ;;  %780 = vpow2.f32 %v699_v31 }
  0xcc   :  { %v1285_v56 = vpop.eup %758  ;;  %782 = vrcp.f32 %v209_v35  ;;  %v211_v3 = vadd.f32 1.0, %v757_v40 }
  0xcd   :  { %v1287_v63 = vpop.eup %760  ;;  %v701_v0 = vmul.f32 -1.442695, %v321_v48  ;;  %784 = vpow2.f32 %v698_v47  ;;  %v700_v13 = vmul.f32 -1.442695, %v320_v55 }
  0xce   :  { %v1289_v2 = vpop.eup %762  ;;  %v295_v4 = vpop.xlane.xlu1 %294  ;;  %786 = vrcp.f32 %v208_v60 }
  0xcf   :  { %v293_v11 = vpop.xlane.xlu0 %292  ;;  %v765_v12 = vpop.eup %764  ;;  %v323_v8 = vadd.f32 %v1275_v7, %v295_v4  ;;  %788 = vpow2.f32 %v701_v0 }
  0xd0   :  { %v322_v18 = vadd.f32 %v1275_v7, %v293_v11  ;;  %v767_v20 = vpop.eup %766  ;;  %790 = vrcp.f32 %v211_v3  ;;  %v210_v31 = vadd.f32 1.0, %v765_v12 }
  0xd1   :  { %v1293_v23 = vpop.eup %768  ;;  %v703_v24 = vmul.f32 -1.442695, %v323_v8  ;;  %v213_v40 = vadd.f32 1.0, %v767_v20  ;;  %792 = vpow2.f32 %v700_v13 }
  0xd2   :  { %v702_v28 = vmul.f32 -1.442695, %v322_v18  ;;  %v1295_v59 = vpop.eup %770  ;;  %v299_v35 = vpop.xlane.xlu1 %298 }
  0xd3   :  { %v297_v36 = vpop.xlane.xlu0 %296  ;;  %v773_v39 = vpop.eup %772  ;;  %v325_v47 = vadd.f32 %v1275_v7, %v299_v35  ;;  %794 = vpow2.f32 %v703_v24 }
  0xd4   :  { %v324_v48 = vadd.f32 %v1275_v7, %v297_v36  ;;  %v775_v55 = vpop.eup %774  ;;  %796 = vpow2.f32 %v702_v28  ;;  %v212_v3 = vadd.f32 1.0, %v773_v39 }
  0xd5   :  { %v1299_v60 = vpop.eup %776  ;;  %v705_v0 = vmul.f32 -1.442695, %v325_v47  ;;  %798 = vrcp.f32 %v210_v31  ;;  %v215_v20 = vadd.f32 1.0, %v775_v55 }
  0xd6   :  { %v704_v4 = vmul.f32 -1.442695, %v324_v48  ;;  %v779_v11 = vpop.eup %778  ;;  %v303_v12 = vpop.xlane.xlu1 %302  ;;  %800 = vrcp.f32 %v213_v40 }
  0xd7   :  { %v301_v8 = vpop.xlane.xlu0 %300  ;;  %v781_v18 = vpop.eup %780  ;;  %v327_v13 = vadd.f32 %v1275_v7, %v303_v12  ;;  %802 = vpow2.f32 %v705_v0  ;;  %v214_v52 = vadd.f32 1.0, %v779_v11 }
  0xd8   :  { %v326_v35 = vadd.f32 %v1275_v7, %v301_v8  ;;  %v1303_v36 = vpop.eup %782  ;;  %804 = vpow2.f32 %v704_v4  ;;  %v383_v31 = vadd.f32 1.0, %v781_v18 }
  0xd9   :  { %1567 = vst [vmem:[#allocation16_spill] sm:$0xff] %v1303_v36  ;;  %v785_v24 = vpop.eup %784  ;;  %v707_v28 = vmul.f32 -1.442695, %v327_v13  ;;  %806 = vrcp.f32 %v212_v3 }
  0xda   :  { %v1305_v47 = vpop.eup %786  ;;  %v307_v39 = vpop.xlane.xlu1 %306  ;;  %808 = vrcp.f32 %v215_v20  ;;  %v706_v40 = vmul.f32 -1.442695, %v326_v35  ;;  %v382_v8 = vadd.f32 1.0, %v785_v24 }
  0xdb   :  { %1568 = vst [vmem:[#allocation17_spill] sm:$0xff] %v1305_v47  ;;  %v305_v48 = vpop.xlane.xlu0 %304  ;;  %v789_v51 = vpop.eup %788  ;;  %v329_v55 = vadd.f32 %v1275_v7, %v307_v39  ;;  %810 = vpow2.f32 %v707_v28 }
  0xdc   :  { %v1308_v12 = vpop.eup %790  ;;  %v328_v0 = vadd.f32 %v1275_v7, %v305_v48  ;;  %812 = vrcp.f32 %v214_v52  ;;  %v385_v11 = vadd.f32 1.0, %v789_v51 }
  0xdd   :  { %1569 = vst [vmem:[#allocation18_spill] sm:$0xff] %v1308_v12  ;;  %v793_v4 = vpop.eup %792  ;;  %814 = vrcp.f32 %v383_v31  ;;  %v709_v18 = vmul.f32 -1.442695, %v329_v55 }
  0xde   :  { %v795_v3 = vpop.eup %794  ;;  %v311_v13 = vpop.xlane.xlu1 %310  ;;  %v384_v35 = vadd.f32 1.0, %v793_v4  ;;  %816 = vpow2.f32 %v706_v40  ;;  %v708_v24 = vmul.f32 -1.442695, %v328_v0  ;;  %v1323_v0 = vstv %s1311_s14 }
  0xdf   :  { %v309_v44 = vpop.xlane.xlu0 %308  ;;  %v797_v20 = vpop.eup %796  ;;  %v331_v39 = vadd.f32 %v1275_v7, %v311_v13  ;;  %818 = vrcp.f32 %v382_v8  ;;  %v387_v52 = vadd.f32 1.0, %v795_v3 }
  0xe0   :  { %v1314_v43 = vpop.eup %798  ;;  %820 = vrcp.f32 %v385_v11  ;;  %v386_v48 = vadd.f32 1.0, %v797_v20  ;;  %v330_v31 = vadd.f32 %v1275_v7, %v309_v44 }
  0xe1   :  { %1570 = vst [vmem:[#allocation19_spill] sm:$0xff] %v1314_v43  ;;  %v1316_v28 = vpop.eup %800  ;;  %822 = vpow2.f32 %v709_v18  ;;  %v711_v40 = vmul.f32 -1.442695, %v331_v39 }
  0xe2   :  { %1571 = vst [vmem:[#allocation20_spill] sm:$0xff] %v1316_v28  ;;  %v803_v51 = vpop.eup %802  ;;  %v315_v55 = vpop.xlane.xlu1 %314  ;;  %824 = vrcp.f32 %v384_v35  ;;  %v710_v44 = vmul.f32 -1.442695, %v330_v31 }
  0xe3   :  { %v313_v38 = vpop.xlane.xlu0 %312  ;;  %v805_v4 = vpop.eup %804  ;;  %v333_v13 = vadd.f32 %v1275_v7, %v315_v55  ;;  %v389_v8 = vadd.f32 1.0, %v803_v51  ;;  %826 = vpow2.f32 %v708_v24 }
  0xe4   :  { %v1320_v37 = vpop.eup %806  ;;  %828 = vrcp.f32 %v387_v52  ;;  %v388_v3 = vadd.f32 1.0, %v805_v4  ;;  %v332_v52 = vadd.f32 %v1275_v7, %v313_v38 }
  0xe5   :  { %1572 = vst [vmem:[#allocation21_spill] sm:$0xff] %v1320_v37  ;;  %v1325_v11 = vpop.eup %808  ;;  %830 = vrcp.f32 %v386_v48  ;;  %v713_v35 = vmul.f32 -1.442695, %v333_v13 }
  0xe6   :  { %1573 = vst [vmem:[#allocation22_spill] sm:$0xff] %v1325_v11  ;;  %v811_v18 = vpop.eup %810  ;;  %v485_v20 = vpop.xlane.xlu1 %484  ;;  %832 = vpow2.f32 %v711_v40  ;;  %v712_v38 = vmul.f32 -1.442695, %v332_v52 }
  0xe7   :  { %v483_v28 = vpop.xlane.xlu0 %482  ;;  %v1327_v1 = vpop.eup %812  ;;  %v517_v39 = vadd.f32 %v1323_v0, %v485_v20  ;;  %834 = vrcp.f32 %v389_v8  ;;  %v391_v24 = vadd.f32 1.0, %v811_v18 }
  0xe8   :  { %1574 = vst [vmem:[#allocation23_spill] sm:$0xff] %v1327_v1  ;;  %v1330_v55 = vpop.eup %814  ;;  %v516_v51 = vadd.f32 %v1323_v0, %v483_v28  ;;  %836 = vrcp.f32 %v388_v3 }
  0xe9   :  { %v817_v11 = vpop.eup %816  ;;  %v716_v48 = vmul.f32 -1.442695, %v517_v39  ;;  %838 = vpow2.f32 %v710_v44 }
  0xea   :  { %v1334_v31 = vpop.eup %818  ;;  %v715_v4 = vmul.f32 -1.442695, %v516_v51  ;;  %v489_v1 = vpop.xlane.xlu1 %488  ;;  %840 = vpow2.f32 %v713_v35  ;;  %v390_v18 = vadd.f32 1.0, %v817_v11 }
  0xeb   :  { %v487_v40 = vpop.xlane.xlu0 %486  ;;  %v1336_v13 = vpop.eup %820  ;;  %v519_v20 = vadd.f32 %v1323_v0, %v489_v1  ;;  %842 = vrcp.f32 %v391_v24 }
  0xec   :  { %v823_v8 = vpop.eup %822  ;;  %v518_v28 = vadd.f32 %v1323_v0, %v487_v40  ;;  %844 = vpow2.f32 %v716_v48 }
  0xed   :  { %v1340_v3 = vpop.eup %824  ;;  %v718_v7 = vmul.f32 -1.442695, %v519_v20  ;;  %846 = vpow2.f32 %v715_v4  ;;  %v393_v11 = vadd.f32 1.0, %v823_v8 }
  0xee   :  { %v827_v39 = vpop.eup %826  ;;  %v717_v44 = vmul.f32 -1.442695, %v518_v28  ;;  %v493_v51 = vpop.xlane.xlu1 %492 }
  0xef   :  { %v491_v37 = vpop.xlane.xlu0 %490  ;;  %v1342_v43 = vpop.eup %828  ;;  %848 = vpow2.f32 %v718_v7  ;;  %v521_v1 = vadd.f32 %v1323_v0, %v493_v51  ;;  %v392_v52 = vadd.f32 1.0, %v827_v39 }
  0xf0   :  { %v1345_v35 = vpop.eup %830  ;;  %850 = vrcp.f32 %v390_v18  ;;  %v520_v24 = vadd.f32 %v1323_v0, %v491_v37 }
  0xf1   :  { %v833_v40 = vpop.eup %832  ;;  %852 = vpow2.f32 %v712_v38  ;;  %v720_v48 = vmul.f32 -1.442695, %v521_v1 }
  0xf2   :  { %v1348_v20 = vpop.eup %834  ;;  %854 = vpow2.f32 %v717_v44  ;;  %v719_v4 = vmul.f32 -1.442695, %v520_v24  ;;  %v497_v28 = vpop.xlane.xlu1 %496  ;;  %v395_v8 = vadd.f32 1.0, %v833_v40 }
  0xf3   :  { %v495_v12 = vpop.xlane.xlu0 %494  ;;  %v1350_v34 = vpop.eup %836  ;;  %856 = vpow2.f32 %v720_v48  ;;  %v523_v7 = vadd.f32 %v1323_v0, %v497_v28 }
  0xf4   :  { %v1353_v51 = vpop.eup %838  ;;  %858 = vrcp.f32 %v393_v11  ;;  %v522_v37 = vadd.f32 %v1323_v0, %v495_v12 }
  0xf5   :  { %v1356_v18 = vpop.eup %840  ;;  %860 = vrcp.f32 %v392_v52  ;;  %v722_v38 = vmul.f32 -1.442695, %v523_v7 }
  0xf6   :  { %v1358_v39 = vpop.eup %842  ;;  %862 = vpow2.f32 %v719_v4  ;;  %v721_v44 = vmul.f32 -1.442695, %v522_v37  ;;  %v501_v1 = vpop.xlane.xlu1 %500 }
  0xf7   :  { %v499_v24 = vpop.xlane.xlu0 %498  ;;  %v845_v62 = vpop.eup %844  ;;  %864 = vpow2.f32 %v722_v38  ;;  %v525_v48 = vadd.f32 %v1323_v0, %v501_v1  ;;  %v1370_v1 = vmul.f32 %v1279_v27, %v990_v5  ;;  %v249_v27 = vmul.f32 %v1287_v63, %v1007_v10 }
  0xf8   :  { %v847_v28 = vpop.eup %846  ;;  %866 = vrcp.f32 %v395_v8  ;;  %v581_v11 = vadd.f32 1.0, %v845_v62  ;;  %v524_v40 = vadd.f32 %v1323_v0, %v499_v24  ;;  %v248_v24 = vmul.f32 %v1281_v32, %v995_v6 }
  0xf9   :  { %v849_v12 = vpop.eup %848  ;;  %v580_v33 = vadd.f32 1.0, %v847_v28  ;;  %868 = vpow2.f32 %v721_v44  ;;  %v724_v52 = vmul.f32 -1.442695, %v525_v48  ;;  %v433_v10 = vmul.f32 %v1336_v13, %v1073_v45 }
  0xfa   :  { %v1362_v7 = vpop.eup %850  ;;  %870 = vrcp.f32 %v581_v11  ;;  %v583_v4 = vadd.f32 1.0, %v849_v12  ;;  %v723_v37 = vmul.f32 -1.442695, %v524_v40  ;;  %v505_v61 = vpop.xlane.xlu1 %504 }
  0xfb   :  { %v503_v47 = vpop.xlane.xlu0 %502  ;;  %v1364_v36 = vpop.eup %852  ;;  %872 = vrcp.f32 %v580_v33  ;;  %v527_v38 = vadd.f32 %v1323_v0, %v505_v61  ;;  %v251_v61 = vmul.f32 %v1285_v56, %v1002_v9  ;;  %v431_v9 = vmul.f32 %v1330_v55, %v1061_v41 }
  0xfc   :  { %v526_v62 = vadd.f32 %v1323_v0, %v503_v47  ;;  %v855_v8 = vpop.eup %854  ;;  %874 = vrcp.f32 %v583_v4  ;;  %v253_v4 = vmul.f32 %v1289_v2, %v1016_v15  ;;  %v430_v56 = vmul.f32 %v1334_v31, %v1066_v42 }
  0xfd   :  { %v857_v44 = vpop.eup %856  ;;  %v582_v48 = vadd.f32 1.0, %v855_v8  ;;  %876 = vpow2.f32 %v724_v52  ;;  %v726_v28 = vmul.f32 -1.442695, %v527_v38  ;;  %v1396_v8 = vmul.f32 %v1293_v23, %v1021_v16 }
  0xfe   :  { %v1374_v11 = vpop.eup %858  ;;  %v585_v33 = vadd.f32 1.0, %v857_v44  ;;  %878 = vpow2.f32 %v723_v37  ;;  %v725_v47 = vmul.f32 -1.442695, %v526_v62  ;;  %v509_v40 = vpop.xlane.xlu1 %508  ;;  %v1400_v15 = vmul.f32 %v1295_v59, %v1028_v19 }
  0xff   :  { %v507_v12 = vpop.xlane.xlu0 %506  ;;  %v1378_v5 = vpop.eup %860  ;;  %880 = vrcp.f32 %v582_v48  ;;  %v529_v6 = vadd.f32 %v1323_v0, %v509_v40  ;;  %v447_v48 = vadd.f32 %v431_v9, %v249_v27  ;;  %v432_v40 = vmul.f32 %v1340_v3, %v1078_v46 }
 0x100   :  { %v528_v32 = vadd.f32 %v1323_v0, %v507_v12  ;;  %v863_v52 = vpop.eup %862  ;;  %882 = vrcp.f32 %v585_v33  ;;  %v449_v33 = vadd.f32 %v433_v10, %v251_v61  ;;  %v397_v46 = vadd.f32 1.0, %v1356_v18 }
 0x101   :  { %v865_v37 = vpop.eup %864  ;;  %v584_v63 = vadd.f32 1.0, %v863_v52  ;;  %884 = vpow2.f32 %v726_v28  ;;  %v728_v38 = vmul.f32 -1.442695, %v529_v6  ;;  %v446_v28 = vadd.f32 %v430_v56, %v248_v24 }
 0x102   :  { %v1392_v62 = vpop.eup %866  ;;  %v587_v41 = vadd.f32 1.0, %v865_v37  ;;  %886 = vpow2.f32 %v725_v47  ;;  %v513_v42 = vpop.xlane.xlu1 %512  ;;  %v727_v45 = vmul.f32 -1.442695, %v528_v32  ;;  %v435_v24 = vmul.f32 %v1342_v43, %v1085_v49 }
 0x103   :  { %v511_v2 = vpop.xlane.xlu0 %510  ;;  %v869_v55 = vpop.eup %868  ;;  %888 = vrcp.f32 %v584_v63  ;;  %v531_v31 = vadd.f32 %v1323_v0, %v513_v42  ;;  %v434_v43 = vmul.f32 %v1345_v35, %v1090_v50  ;;  %v437_v10 = vmul.f32 %v1348_v20, %v1097_v53 }
 0x104   :  { %v530_v13 = vadd.f32 %v1323_v0, %v511_v2  ;;  %v871_v44 = vpop.eup %870  ;;  %890 = vrcp.f32 %v587_v41  ;;  %v586_v16 = vadd.f32 1.0, %v869_v55  ;;  %v451_v37 = vadd.f32 %v435_v24, %v253_v4  ;;  %v924_v2 = vld [vmem:[%s1539_s0 + $0x30] sm:$0xff]  ;;  %v1578_v24 = vld [vmem:[#allocation8_spill] sm:$0xff] }
 0x105   :  { %v873_v23 = vpop.eup %872  ;;  %v629_v19 = vmul.f32 %v871_v44, %v1148_v14  ;;  %892 = vpow2.f32 %v728_v38  ;;  %v730_v59 = vmul.f32 -1.442695, %v531_v31  ;;  %v394_v14 = vadd.f32 1.0, %v1353_v51 }
 0x106   :  { %v875_v47 = vpop.eup %874  ;;  %v628_v12 = vmul.f32 %v873_v23, %v1153_v17  ;;  %894 = vrcp.f32 %v586_v16  ;;  %v729_v6 = vmul.f32 -1.442695, %v530_v13  ;;  %v396_v35 = vadd.f32 1.0, %v1364_v36  ;;  %v925_v23 = vld [vmem:[%s1539_s0 + $0x48] sm:$0xff] }
 0x107   :  { %v877_v0 = vpop.eup %876  ;;  %v645_v27 = vadd.f32 %v629_v19, %v447_v48  ;;  %v631_v32 = vmul.f32 %v875_v47, %v1162_v21  ;;  %896 = vpow2.f32 %v727_v45  ;;  %v448_v21 = vadd.f32 %v432_v40, %v1370_v1  ;;  %v1576_v19 = vld [vmem:[#allocation17_spill] sm:$0xff] }
 0x108   :  { %v879_v61 = vpop.eup %878  ;;  %v644_v52 = vadd.f32 %v628_v12, %v446_v28  ;;  %v589_v9 = vadd.f32 1.0, %v877_v0  ;;  %898 = vpow2.f32 %v730_v59  ;;  %v436_v4 = vmul.f32 %v1350_v34, %v1102_v54 }
 0x109   :  { %v881_v56 = vpop.eup %880  ;;  %661 = vst [vmem:[%s1544_s5 + $0x8] sm:$0xff] %v645_v27  ;;  %v647_v17 = vadd.f32 %v631_v32, %v449_v33  ;;  %v588_v3 = vadd.f32 1.0, %v879_v61  ;;  %900 = vpow2.f32 %v729_v6  ;;  %v450_v42 = vadd.f32 %v434_v43, %v1396_v8  ;;  %v1575_v33 = vld [vmem:[#allocation16_spill] sm:$0xff]  ;;  %v1577_v6 = vld [vmem:[#allocation5_spill] sm:$0xff]  ;;  %v928_v43 = vld [vmem:[%s1539_s0 + $0x50] sm:$0xff] }
 0x10a   :  { %v883_v49 = vpop.eup %882  ;;  %660 = vst [vmem:[%s1544_s5] sm:$0xff] %v644_v52  ;;  %v630_v51 = vmul.f32 %v881_v56, %v1167_v22  ;;  %902 = vrcp.f32 %v589_v9  ;;  %v254_v54 = vmul.f32 %v924_v2, %v1299_v60  ;;  %v453_v34 = vadd.f32 %v437_v10, %v1400_v15  ;;  %v1580_v9 = vld [vmem:[#allocation9_spill] sm:$0xff] }
 0x10b   :  { %v885_v18 = vpop.eup %884  ;;  %663 = vst [vmem:[%s1544_s5 + $0x18] sm:$0xff] %v647_v17  ;;  %v633_v1 = vmul.f32 %v883_v49, %v1176_v25  ;;  %904 = vrcp.f32 %v588_v3  ;;  %v439_v44 = vmul.f32 %v1358_v39, %v1109_v57  ;;  %v438_v28 = vmul.f32 %v1362_v7, %v1114_v58  ;;  %v926_v7 = vld [vmem:[%s1539_s0 + $0x40] sm:$0xff]  ;;  %v1581_v17 = vld [vmem:[#allocation18_spill] sm:$0xff] }
 0x10c   :  { %v887_v50 = vpop.eup %886  ;;  %906 = vrcp.f32 %v394_v14  ;;  %v646_v63 = vadd.f32 %v630_v51, %v448_v21  ;;  %v591_v38 = vadd.f32 1.0, %v885_v18  ;;  %v452_v13 = vadd.f32 %v436_v4, %v254_v54  ;;  %v1579_v14 = vld [vmem:[#allocation6_spill] sm:$0xff]  ;;  %v1582_v51 = vld [vmem:[#allocation19_spill] sm:$0xff]  ;;  %v931_v54 = vld [vmem:[%s1540_s1 + $0x78] sm:$0xff] }
 0x10d   :  { %v889_v22 = vpop.eup %888  ;;  %908 = vrcp.f32 %v397_v46  ;;  %v649_v41 = vadd.f32 %v633_v1, %v451_v37  ;;  %v590_v53 = vadd.f32 1.0, %v887_v50  ;;  %v257_v57 = vmul.f32 %v925_v23, %v1575_v33  ;;  %v1583_v1 = vld [vmem:[#allocation7_spill] sm:$0xff] }
 0x10e   :  { %v891_v20 = vpop.eup %890  ;;  %662 = vst [vmem:[%s1544_s5 + $0x10] sm:$0xff] %v646_v63  ;;  %v632_v25 = vmul.f32 %v889_v22, %v1181_v26  ;;  %910 = vrcp.f32 %v591_v38  ;;  %v256_v59 = vmul.f32 %v926_v7, %v1576_v19  ;;  %v441_v0 = vmul.f32 %v1374_v11, %v1577_v6  ;;  %v927_v11 = vld [vmem:[%s1539_s0 + $0x58] sm:$0xff]  ;;  %v1585_v4 = vld [vmem:[#allocation11_spill] sm:$0xff]  ;;  %v1591_v7 = vld [vmem:[#allocation13_spill] sm:$0xff] }
 0x10f   :  { %v893_v36 = vpop.eup %892  ;;  %665 = vst [vmem:[%s1544_s5 + $0x28] sm:$0xff] %v649_v41  ;;  %v635_v8 = vmul.f32 %v891_v20, %v1190_v29  ;;  %912 = vrcp.f32 %v590_v53  ;;  %v455_v12 = vadd.f32 %v439_v44, %v257_v57  ;;  %v440_v52 = vmul.f32 %v1378_v5, %v1579_v14  ;;  %v929_v53 = vld [vmem:[%s1539_s0 + $0x68] sm:$0xff]  ;;  %v1586_v20 = vld [vmem:[#allocation20_spill] sm:$0xff]  ;;  %v935_v33 = vld [vmem:[%s1539_s0 + $0x70] sm:$0xff] }
 0x110   :  { %v895_v55 = vpop.eup %894  ;;  %914 = vrcp.f32 %v396_v35  ;;  %v648_v26 = vadd.f32 %v632_v25, %v450_v42  ;;  %v593_v45 = vadd.f32 1.0, %v893_v36  ;;  %v454_v61 = vadd.f32 %v438_v28, %v256_v59  ;;  %v1584_v35 = vld [vmem:[#allocation10_spill] sm:$0xff]  ;;  %v930_v42 = vld [vmem:[%s1540_s1 + $0x60] sm:$0xff]  ;;  %v934_v28 = vld [vmem:[%s1539_s0 + $0x78] sm:$0xff] }
 0x111   :  { %v897_v31 = vpop.eup %896  ;;  %v651_v48 = vadd.f32 %v635_v8, %v453_v34  ;;  %v634_v60 = vmul.f32 %v895_v55, %v1195_v30  ;;  %v259_v3 = vmul.f32 %v927_v11, %v1581_v17  ;;  %v258_v18 = vmul.f32 %v928_v43, %v1582_v51  ;;  %v932_v55 = vld [vmem:[%s1539_s0 + $0x60] sm:$0xff]  ;;  %v1590_v57 = vld [vmem:[#allocation23_spill] sm:$0xff] }
 0x112   :  { %v899_v15 = vpop.eup %898  ;;  %664 = vst [vmem:[%s1544_s5 + $0x20] sm:$0xff] %v648_v26  ;;  %916 = vrcp.f32 %v593_v45  ;;  %v592_v29 = vadd.f32 1.0, %v897_v31  ;;  %v443_v50 = vmul.f32 %v1392_v62, %v1583_v1  ;;  %v261_v62 = vmul.f32 %v929_v53, %v1586_v20  ;;  %v1587_v26 = vld [vmem:[#allocation21_spill] sm:$0xff] }
 0x113   :  { %v901_v16 = vpop.eup %900  ;;  %667 = vst [vmem:[%s1544_s5 + $0x38] sm:$0xff] %v651_v48  ;;  %v650_v30 = vadd.f32 %v634_v60, %v452_v13  ;;  %v595_v39 = vadd.f32 1.0, %v899_v15  ;;  %v457_v10 = vadd.f32 %v441_v0, %v259_v3  ;;  %v456_v22 = vadd.f32 %v440_v52, %v258_v18  ;;  %v933_v13 = vld [vmem:[%s1540_s1 + $0x70] sm:$0xff]  ;;  %v1588_v48 = vld [vmem:[#allocation12_spill] sm:$0xff] }
 0x114   :  { %v903_v58 = vpop.eup %902  ;;  %918 = vrcp.f32 %v592_v29  ;;  %v594_v47 = vadd.f32 1.0, %v901_v16  ;;  %v260_v45 = vmul.f32 %v932_v55, %v1587_v26  ;;  %v459_v31 = vadd.f32 %v443_v50, %v261_v62  ;;  %v1589_v29 = vld [vmem:[#allocation22_spill] sm:$0xff] }
 0x115   :  { %v905_v40 = vpop.eup %904  ;;  %666 = vst [vmem:[%s1544_s5 + $0x30] sm:$0xff] %v650_v30  ;;  %v637_v27 = vmul.f32 %v903_v58, %v1578_v24  ;;  %920 = vrcp.f32 %v595_v39  ;;  %v263_v16 = vmul.f32 %v934_v28, %v1589_v29  ;;  %v262_v30 = vmul.f32 %v935_v33, %v1590_v57  ;;  %v1593_v24 = vld [vmem:[#allocation15_spill] sm:$0xff] }
 0x116   :  { %v907_v32 = vpop.eup %906  ;;  %v636_v56 = vmul.f32 %v905_v40, %v1580_v9  ;;  %922 = vrcp.f32 %v594_v47  ;;  %v1592_v40 = vld [vmem:[#allocation14_spill] sm:$0xff] }
 0x117   :  { %v909_v46 = vpop.eup %908  ;;  %v653_v49 = vadd.f32 %v637_v27, %v455_v12  ;;  %v442_v25 = vmul.f32 %v930_v42, %v907_v32 }
 0x118   :  { %v911_v21 = vpop.eup %910  ;;  %v652_v37 = vadd.f32 %v636_v56, %v454_v61  ;;  %v445_v34 = vmul.f32 %v931_v54, %v909_v46 }
 0x119   :  { %v913_v5 = vpop.eup %912  ;;  %669 = vst [vmem:[%s1544_s5 + $0x48] sm:$0xff] %v653_v49  ;;  %v639_v63 = vmul.f32 %v911_v21, %v1584_v35  ;;  %v458_v39 = vadd.f32 %v442_v25, %v260_v45 }
 0x11a   :  { %v915_v38 = vpop.eup %914  ;;  %668 = vst [vmem:[%s1544_s5 + $0x40] sm:$0xff] %v652_v37  ;;  %v638_v41 = vmul.f32 %v913_v5, %v1585_v4  ;;  %v461_v47 = vadd.f32 %v445_v34, %v263_v16 }
 0x11b   :  { %v655_v36 = vadd.f32 %v639_v63, %v457_v10  ;;  %v444_v44 = vmul.f32 %v933_v13, %v915_v38 }
 0x11c   :  { %v917_v2 = vpop.eup %916  ;;  %v654_v8 = vadd.f32 %v638_v41, %v456_v22 }
 0x11d   :  { %671 = vst [vmem:[%s1544_s5 + $0x58] sm:$0xff] %v655_v36  ;;  %v641_v60 = vmul.f32 %v917_v2, %v1588_v48  ;;  %v460_v6 = vadd.f32 %v444_v44, %v262_v30 }
 0x11e   :  { %v919_v15 = vpop.eup %918  ;;  %670 = vst [vmem:[%s1544_s5 + $0x50] sm:$0xff] %v654_v8 }
 0x11f   :  { %v921_v23 = vpop.eup %920  ;;  %v657_v58 = vadd.f32 %v641_v60, %v459_v31  ;;  %v640_v19 = vmul.f32 %v919_v15, %v1591_v7 }
 0x120   :  { %v923_v59 = vpop.eup %922  ;;  %v643_v12 = vmul.f32 %v921_v23, %v1592_v40 }
 0x121   :  { %673 = vst [vmem:[%s1544_s5 + $0x68] sm:$0xff] %v657_v58  ;;  %v656_v0 = vadd.f32 %v640_v19, %v458_v39  ;;  %v642_v27 = vmul.f32 %v923_v59, %v1593_v24 }
 0x122   :  { %v659_v32 = vadd.f32 %v643_v12, %v461_v47 }
 0x123   :  { %672 = vst [vmem:[%s1544_s5 + $0x60] sm:$0xff] %v656_v0  ;;  %v658_v61 = vadd.f32 %v642_v27, %v460_v6 }
 0x124   :  { %675 = vst [vmem:[%s1544_s5 + $0x78] sm:$0xff] %v659_v32 }
 0x125   :  { %674 = vst [vmem:[%s1544_s5 + $0x70] sm:$0xff] %v658_v61 }
 0x126   :  { %680 = vsyncpa [#allocation3], 1 }

</bundles_post_ra>
